<compile_context>
chip_gen: v6e
topology: v6e:2x2x1
jax: 0.10.0
libtpu: 0.0.40
codegen_flags: <defaults>
</compile_context>

<pallas_src>
import functools

import jax
import jax.numpy as jnp
from jax.experimental import pallas as pl
from jax.experimental.pallas import tpu as pltpu


_S_CHUNK = 8  # subword-axis chunk for the counts build (bounds the 3-D intermediate's footprint)


def fasttext_bag_kernel(idx_ref, w_ref, out_ref, acc_ref):
    # idx_ref: (B_TILE, S)   int32 -- subword ids for this batch tile (same block every vocab step)
    # w_ref:   (V_TILE, Ep)  bf16  -- one vocab tile of the (padded) embedding matrix
    # out_ref: (B_TILE, Ep)  f32   -- HBM-backed output block, written once on the last vocab step
    # acc_ref: (B_TILE, Ep)  f32   -- VMEM scratch accumulator, resident across the vocab axis
    v = pl.program_id(1)
    nv = pl.num_programs(1)

    @pl.when(v == 0)
    def _init():
        acc_ref[...] = jnp.zeros_like(acc_ref)

    v_tile = w_ref.shape[0]
    b_tile, s_len = idx_ref.shape

    # Global vocab ids covered by this tile, hoisted out of the S loop (JAX does not CSE
    # broadcast_in_dim).  Shape (1, 1, V_TILE): lane-dense.
    vocab_ids = v * v_tile + jax.lax.broadcasted_iota(jnp.int32, (1, 1, v_tile), 2)

    idx = idx_ref[...]                                      # (B_TILE, S) int32

    # counts[b, j] = #{s : idx[b, s] == v*V_TILE + j}.
    # Compare a whole (B_TILE, S_chunk, V_TILE) block at once (one VALU compare per element)
    # and reduce the S axis via a sublane-axis sum (XLU), instead of S separate
    # compare + bool->f32 + add passes that saturate the VALU slot.
    counts = jnp.zeros((b_tile, v_tile), jnp.float32)
    for s0 in range(0, s_len, _S_CHUNK):                    # static, small trip count
        chunk = idx[:, s0:s0 + _S_CHUNK]                    # (B_TILE, <=_S_CHUNK)
        eq = (chunk[:, :, None] == vocab_ids).astype(jnp.float32)
        counts = counts + eq.sum(axis=1)

    # counts <= S (small exact integers) so the bf16 cast is exact (requires S <= 256);
    # MXU accumulates in f32 into the resident VMEM scratch.
    acc_ref[...] += jnp.dot(counts.astype(w_ref.dtype), w_ref[...],
                            preferred_element_type=jnp.float32)

    @pl.when(v == nv - 1)
    def _finish():
        out_ref[...] = acc_ref[...].astype(out_ref.dtype)


def _round_up(x, m):
    return (x + m - 1) // m * m


@functools.partial(jax.jit, static_argnames=("b_tile", "v_tile"))
def fasttext_forward(xinput, weights, *, b_tile=256, v_tile=512):
    """xinput: (B, S) int subword ids; weights: (V+1, E) f32 with weights[V] == 0 (padding row).

    Returns (B, E) f32 == Embedding(weights, padding_idx=V)(xinput).sum(dim=1).

    Tiling notes:
      * b_tile/v_tile are clamped to the padded problem, so tiny inputs don't over-pad and
        small vocabularies run a single vocab step with the whole table resident in VMEM.
      * On v7x, prefer b_tile <= ceil(B/2) rounded to 8 for large batches so the "parallel"
        batch axis keeps >= 2 tiles and shards across both TensorCores.
    """
    B, S = xinput.shape
    Vp, E = weights.shape
    pad_idx = Vp - 1
    assert S <= 256, "bf16 counts operand is only exact for S <= 256"

    # Clamp tiles to the padded problem size (keeps the demo cheap; full tiles for real shapes).
    b_tile = min(b_tile, _round_up(B, 8))
    v_tile = min(v_tile, _round_up(Vp, 128))

    # MXU operands in bf16; f32 accumulation keeps the bag-sum accurate.
    w = weights.astype(jnp.bfloat16)

    # Lane-dense embedding dim: pad E to a multiple of 128 with zero columns (sliced off below).
    Ep = _round_up(E, 128)
    if Ep != E:
        w = jnp.pad(w, ((0, 0), (0, Ep - E)))

    # Pad vocab to a v_tile multiple with zero rows (never indexed) and the batch to a b_tile
    # multiple with padding-only rows (they sum to 0 and are sliced off below).
    v_pad = _round_up(Vp, v_tile) - Vp
    if v_pad:
        w = jnp.pad(w, ((0, v_pad), (0, 0)))
    idx = xinput.astype(jnp.int32)
    b_pad = _round_up(B, b_tile) - B
    if b_pad:
        idx = jnp.pad(idx, ((0, b_pad), (0, 0)), constant_values=pad_idx)

    grid = (idx.shape[0] // b_tile, w.shape[0] // v_tile)
    out = pl.pallas_call(
        fasttext_bag_kernel,
        out_shape=jax.ShapeDtypeStruct((idx.shape[0], Ep), jnp.float32),
        grid_spec=pltpu.PrefetchScalarGridSpec(
            num_scalar_prefetch=0,
            grid=grid,
            in_specs=[
                pl.BlockSpec((b_tile, S), lambda i, v: (i, 0)),    # same idx tile every vocab step
                pl.BlockSpec((v_tile, Ep), lambda i, v: (v, 0)),   # stream vocab tiles of the table
            ],
            out_specs=pl.BlockSpec((b_tile, Ep), lambda i, v: (i, 0)),
            scratch_shapes=[pltpu.VMEM((b_tile, Ep), jnp.float32)],
        ),
        compiler_params=pltpu.CompilerParams(
            dimension_semantics=("parallel", "arbitrary")),
    )(idx, w)
    return out[:B, :E]


if __name__ == "__main__":
    key = jax.random.PRNGKey(0)

    # --- Case 1: lane-dense E=128, small vocab (whole padded table fits in one vocab tile). ---
    vocab_size, embedding_size, B, S = 500, 128, 16, 16
    k1, k2, key = jax.random.split(key, 3)
    input_matrix = 0.1 * jax.random.normal(k1, (vocab_size, embedding_size), jnp.float32)
    # FastTextTorch appends a zero row used as padding_idx.
    weights = jnp.concatenate(
        [input_matrix, jnp.zeros((1, embedding_size), jnp.float32)], axis=0)
    pad_idx = vocab_size
    xinput = jax.random.randint(k2, (B, S), 0, vocab_size, dtype=jnp.int32)
    xinput = xinput.at[:, -3:].set(pad_idx)      # some tokens have fewer subwords than S
    out = jax.block_until_ready(fasttext_forward(xinput, weights))
    ref = jnp.take(weights, xinput, axis=0).sum(axis=1)
    assert out.shape == (B, embedding_size)
    max_err = float(jnp.max(jnp.abs(out - ref)))
    assert max_err < 1e-2, max_err               # bf16 MXU operands vs f32 reference

    # --- Case 2: FastText-like lane-sparse E=100 (padded to 128 inside the wrapper). ---
    vocab_size, embedding_size, B, S = 300, 100, 8, 12
    k1, k2, key = jax.random.split(key, 3)
    input_matrix = 0.1 * jax.random.normal(k1, (vocab_size, embedding_size), jnp.float32)
    weights = jnp.concatenate(
        [input_matrix, jnp.zeros((1, embedding_size), jnp.float32)], axis=0)
    pad_idx = vocab_size
    xinput = jax.random.randint(k2, (B, S), 0, vocab_size, dtype=jnp.int32)
    xinput = xinput.at[:, -2:].set(pad_idx)
    out = jax.block_until_ready(fasttext_forward(xinput, weights))
    ref = jnp.take(weights, xinput, axis=0).sum(axis=1)
    assert out.shape == (B, embedding_size)
    max_err = float(jnp.max(jnp.abs(out - ref)))
    assert max_err < 1e-2, max_err

    print("KERNEL_OK")
</pallas_src>

<mosaic_0001>
module attributes {stable_mosaic.version = 11 : i64} {
  func.func @fasttext_bag_kernel(%arg0: i32, %arg1: i32, %arg2: memref<16x16xi32, #tpu.memory_space<vmem>>, %arg3: memref<512x128xbf16, #tpu.memory_space<vmem>>, %arg4: memref<16x128xf32, #tpu.memory_space<vmem>>, %arg5: memref<16x128xf32, #tpu.memory_space<vmem>>) attributes {dimension_semantics = [#tpu.dimension_semantics<parallel>, #tpu.dimension_semantics<arbitrary>], iteration_bounds = array<i64: 1, 1>, scalar_prefetch = 0 : i64, scratch_operands = 1 : i64, tpu.core_type = #tpu.core_type<tc>, window_params = [{transform_indices = @transform_0, window_bounds = array<i64: 16, 16>}, {transform_indices = @transform_1, window_bounds = array<i64: 512, 128>}, {transform_indices = @transform_2, window_bounds = array<i64: 16, 128>}]} {
    %c0_i32 = arith.constant 0 : i32
    %0 = arith.cmpi eq, %arg1, %c0_i32 : i32
    %1 = arith.extui %0 : i1 to i32
    %c0_i32_0 = arith.constant 0 : i32
    %2 = arith.cmpi ne, %1, %c0_i32_0 : i32
    scf.if %2 {
      %cst_13 = arith.constant 0.000000e+00 : f32
      %36 = vector.broadcast %cst_13 : f32 to vector<16x128xf32>
      %c0_14 = arith.constant 0 : index
      %c0_15 = arith.constant 0 : index
      %37 = vector.load %arg5[%c0_14, %c0_15] : memref<16x128xf32, #tpu.memory_space<vmem>>, vector<16x128xf32>
      tpu.vector_store %arg5[%c0_14, %c0_15], %36 {strides = array<i32>} : memref<16x128xf32, #tpu.memory_space<vmem>>, vector<16x128xf32>,
    } else {
    }
    %c512_i32 = arith.constant 512 : i32
    %3 = arith.muli %arg1, %c512_i32 : i32
    %4 = tpu.iota {dimensions = array<i32: 2>} : vector<1x1x512xi32>
    %5 = vector.broadcast %3 : i32 to vector<1x1x512xi32>
    %6 = arith.addi %5, %4 : vector<1x1x512xi32>
    %c0 = arith.constant 0 : index
    %c0_1 = arith.constant 0 : index
    %7 = vector.load %arg2[%c0, %c0_1] : memref<16x16xi32, #tpu.memory_space<vmem>>, vector<16x16xi32>
    %cst = arith.constant 0.000000e+00 : f32
    %8 = vector.broadcast %cst : f32 to vector<16x512xf32>
    %9 = vector.extract_strided_slice %7 {offsets = [0, 0], sizes = [16, 8], strides = [1, 1]} : vector<16x16xi32> to vector<16x8xi32>
    %10 = vector.shape_cast %9 : vector<16x8xi32> to vector<16x8x1xi32>
    %11 = vector.broadcast %10 : vector<16x8x1xi32> to vector<16x8x512xi32>
    %12 = vector.broadcast %6 : vector<1x1x512xi32> to vector<16x8x512xi32>
    %13 = arith.cmpi eq, %11, %12 : vector<16x8x512xi32>
    %14 = arith.extui %13 : vector<16x8x512xi1> to vector<16x8x512xi32>
    %15 = arith.sitofp %14 : vector<16x8x512xi32> to vector<16x8x512xf32>
    %cst_2 = arith.constant dense<0.000000e+00> : vector<16x512xf32>
    %16 = vector.multi_reduction <add>, %15, %cst_2 [1] : vector<16x8x512xf32> to vector<16x512xf32>
    %17 = arith.addf %8, %16 : vector<16x512xf32>
    %18 = vector.extract_strided_slice %7 {offsets = [0, 8], sizes = [16, 8], strides = [1, 1]} : vector<16x16xi32> to vector<16x8xi32>
    %19 = vector.shape_cast %18 : vector<16x8xi32> to vector<16x8x1xi32>
    %20 = vector.broadcast %19 : vector<16x8x1xi32> to vector<16x8x512xi32>
    %21 = vector.broadcast %6 : vector<1x1x512xi32> to vector<16x8x512xi32>
    %22 = arith.cmpi eq, %20, %21 : vector<16x8x512xi32>
    %23 = arith.extui %22 : vector<16x8x512xi1> to vector<16x8x512xi32>
    %24 = arith.sitofp %23 : vector<16x8x512xi32> to vector<16x8x512xf32>
    %cst_3 = arith.constant dense<0.000000e+00> : vector<16x512xf32>
    %25 = vector.multi_reduction <add>, %24, %cst_3 [1] : vector<16x8x512xf32> to vector<16x512xf32>
    %26 = arith.addf %17, %25 : vector<16x512xf32>
    %c0_4 = arith.constant 0 : index
    %c0_5 = arith.constant 0 : index
    %27 = vector.load %arg5[%c0_4, %c0_5] : memref<16x128xf32, #tpu.memory_space<vmem>>, vector<16x128xf32>
    %28 = arith.truncf %26 : vector<16x512xf32> to vector<16x512xbf16>
    %c0_6 = arith.constant 0 : index
    %c0_7 = arith.constant 0 : index
    %29 = vector.load %arg3[%c0_6, %c0_7] : memref<512x128xbf16, #tpu.memory_space<vmem>>, vector<512x128xbf16>
    %cst_8 = arith.constant dense<0.000000e+00> : vector<16x128xf32>
    %30 = tpu.matmul %28, %29, %cst_8 {dimension_numbers = #tpu.dot_dimension_numbers<[1], [0], [0], [1], [0, 0, 1, 1], [], []>} : vector<16x512xbf16>, vector<512x128xbf16>, vector<16x128xf32> -> vector<16x128xf32>
    %31 = arith.addf %27, %30 : vector<16x128xf32>
    %c0_9 = arith.constant 0 : index
    %c0_10 = arith.constant 0 : index
    %32 = vector.load %arg5[%c0_9, %c0_10] : memref<16x128xf32, #tpu.memory_space<vmem>>, vector<16x128xf32>
    tpu.vector_store %arg5[%c0_9, %c0_10], %31 {strides = array<i32>} : memref<16x128xf32, #tpu.memory_space<vmem>>, vector<16x128xf32>,
    %c0_i32_11 = arith.constant 0 : i32
    %33 = arith.cmpi eq, %arg1, %c0_i32_11 : i32
    %34 = arith.extui %33 : i1 to i32
    %c0_i32_12 = arith.constant 0 : i32
    %35 = arith.cmpi ne, %34, %c0_i32_12 : i32
    scf.if %35 {
      %c0_13 = arith.constant 0 : index
      %c0_14 = arith.constant 0 : index
      %36 = vector.load %arg5[%c0_13, %c0_14] : memref<16x128xf32, #tpu.memory_space<vmem>>, vector<16x128xf32>
      %c0_15 = arith.constant 0 : index
      %c0_16 = arith.constant 0 : index
      %37 = vector.load %arg4[%c0_15, %c0_16] : memref<16x128xf32, #tpu.memory_space<vmem>>, vector<16x128xf32>
      tpu.vector_store %arg4[%c0_15, %c0_16], %36 {strides = array<i32>} : memref<16x128xf32, #tpu.memory_space<vmem>>, vector<16x128xf32>,
    } else {
    }
    return
  }
  func.func @transform_0(%arg0: i32, %arg1: i32) -> (i32, i32) {
    %c0_i32 = arith.constant 0 : i32
    %c0_i32_0 = arith.constant 0 : i32
    return %arg0, %c0_i32 : i32, i32
  }
  func.func @transform_1(%arg0: i32, %arg1: i32) -> (i32, i32) {
    %c0_i32 = arith.constant 0 : i32
    %c0_i32_0 = arith.constant 0 : i32
    return %arg1, %c0_i32 : i32, i32
  }
  func.func @transform_2(%arg0: i32, %arg1: i32) -> (i32, i32) {
    %c0_i32 = arith.constant 0 : i32
    %c0_i32_0 = arith.constant 0 : i32
    return %arg0, %c0_i32 : i32, i32
  }
}

</mosaic_0001>

<bundles_post_ra>
// kernel: fasttext_forward.1
= control target key start
LH: loop header
LB: loop body
LE: loop exit
PB: predicated region body
PF: predicated region fallthrough
CT: control target
= control target key end

     0   :  { %v20_v0 = vlaneseq  ;;  %s3353_s0 = inlined_call_operand.vmem [shape: s32[16,16], index: 0, kind: input, shape index: {}]   ;;  %s3354_s1 = inlined_call_operand.vmem [shape: bf16[512,128], index: 1, kind: input, shape index: {}]   ;;  %s3355_s2 = inlined_call_operand.hbm [shape: f32[16,128], index: 2, kind: output, shape index: {}]  }
   0x1   :  { %v31_v1 = vld [vmem:[%s3353_s0 + $0x8] sm:$0xff]  ;;  %v30_v3 = vld [vmem:[%s3353_s0] sm:$0xff] }
   0x2   :  { %v33_v2 = vshrl.u32 %v20_v0, 7 }
   0x4   :  { %v34_v4 = vsub.s32 0, %v33_v2  ;;  %v41_v5 = vsub.s32 1, %v33_v2  ;;  %v48_v10 = vsub.s32 2, %v33_v2  ;;  %v55_v11 = vsub.s32 3, %v33_v2 }
   0x6   :  { %v91_v6 = vrot.slane %v31_v1, %v34_v4  ;;  %v35_v7 = vrot.slane %v30_v3, %v34_v4  ;;  %v98_v8 = vrot.slane %v31_v1, %v41_v5  ;;  %v42_v9 = vrot.slane %v30_v3, %v41_v5 }
   0x7   :  { %v105_v12 = vrot.slane %v31_v1, %v48_v10  ;;  %v49_v13 = vrot.slane %v30_v3, %v48_v10 }
   0x8   :  { %93 = vbcast.lane.b32.xlu1 %v91_v6, 256  ;;  %37 = vbcast.lane.b32.xlu0 %v35_v7, 256 }
   0xc   :  { %100 = vbcast.lane.b32.xlu1 %v98_v8, 256  ;;  %44 = vbcast.lane.b32.xlu0 %v42_v9, 256 }
  0x10   :  { %790 = vbcast.lane.b32.xlu1 %v42_v9, 264  ;;  %786 = vbcast.lane.b32.xlu0 %v35_v7, 264 }
  0x14   :  { %822 = vbcast.lane.b32.xlu1 %v98_v8, 264  ;;  %818 = vbcast.lane.b32.xlu0 %v91_v6, 264 }
  0x18   :  { %107 = vbcast.lane.b32.xlu1 %v105_v12, 256  ;;  %51 = vbcast.lane.b32.xlu0 %v49_v13, 256 }
  0x19   :  { %7 = vsyncpa [#allocation4], 0  ;;  %v112_v14 = vrot.slane %v31_v1, %v55_v11  ;;  %v56_v15 = vrot.slane %v30_v3, %v55_v11  ;;  %v62_v16 = vsub.s32 4, %v33_v2  ;;  %v69_v19 = vsub.s32 5, %v33_v2 }
  0x1a   :  { %v76_v22 = vsub.s32 6, %v33_v2  ;;  %v83_v25 = vsub.s32 7, %v33_v2  ;;  %v2405_v28 = vand.u32 127, %v20_v0  ;;  %v3356_v34 = vmov 0.0  }
  0x1b   :  { %v119_v17 = vrot.slane %v31_v1, %v62_v16  ;;  %v63_v18 = vrot.slane %v30_v3, %v62_v16  ;;  %v126_v20 = vrot.slane %v31_v1, %v69_v19  ;;  %v70_v21 = vrot.slane %v30_v3, %v69_v19 }
  0x1c   :  { %826 = vbcast.lane.b32.xlu1 %v105_v12, 264  ;;  %794 = vbcast.lane.b32.xlu0 %v49_v13, 264  ;;  %v133_v23 = vrot.slane %v31_v1, %v76_v22  ;;  %v77_v24 = vrot.slane %v30_v3, %v76_v22  ;;  %v140_v26 = vrot.slane %v31_v1, %v83_v25  ;;  %v2408_v29 = vadd.s32 128, %v2405_v28 }
  0x1d   :  { %v84_v27 = vrot.slane %v30_v3, %v83_v25  ;;  %v2411_v30 = vadd.s32 256, %v2405_v28  ;;  %v2414_v31 = vadd.s32 384, %v2405_v28 }
  0x20   :  { %114 = vbcast.lane.b32.xlu1 %v112_v14, 256  ;;  %58 = vbcast.lane.b32.xlu0 %v56_v15, 256 }
  0x24   :  { %830 = vbcast.lane.b32.xlu1 %v112_v14, 264  ;;  %798 = vbcast.lane.b32.xlu0 %v56_v15, 264 }
  0x28   :  { %121 = vbcast.lane.b32.xlu1 %v119_v17, 256  ;;  %65 = vbcast.lane.b32.xlu0 %v63_v18, 256 }
  0x2c   :  { %834 = vbcast.lane.b32.xlu1 %v119_v17, 264  ;;  %802 = vbcast.lane.b32.xlu0 %v63_v18, 264 }
  0x30   :  { %128 = vbcast.lane.b32.xlu1 %v126_v20, 256  ;;  %72 = vbcast.lane.b32.xlu0 %v70_v21, 256 }
  0x34   :  { %838 = vbcast.lane.b32.xlu1 %v126_v20, 264  ;;  %806 = vbcast.lane.b32.xlu0 %v70_v21, 264 }
  0x38   :  { %135 = vbcast.lane.b32.xlu1 %v133_v23, 256  ;;  %79 = vbcast.lane.b32.xlu0 %v77_v24, 256 }
  0x3c   :  { %842 = vbcast.lane.b32.xlu1 %v133_v23, 264  ;;  %810 = vbcast.lane.b32.xlu0 %v77_v24, 264 }
  0x40   :  { %142 = vbcast.lane.b32.xlu1 %v140_v26, 256  ;;  %86 = vbcast.lane.b32.xlu0 %v84_v27, 256 }
  0x44   :  { %846 = vbcast.lane.b32.xlu1 %v140_v26, 264  ;;  %814 = vbcast.lane.b32.xlu0 %v84_v27, 264 }
  0x7a   :  { %v94_v32 = vpop.permute.xlu1 %93  ;;  %v38_v33 = vpop.permute.xlu0 %37 }
  0x7b   :  { %vm176_vm0 = vcmp.eq.s32.totalorder %v94_v32, %v2405_v28  ;;  %vm177_vm1 = vcmp.eq.s32.totalorder %v94_v32, %v2408_v29  ;;  %vm178_vm2 = vcmp.eq.s32.totalorder %v94_v32, %v2411_v30  ;;  %vm179_vm3 = vcmp.eq.s32.totalorder %v94_v32, %v2414_v31 }
  0x7c   :  { %v2150_v35 = vsel %vm176_vm0, 1.0, %v3356_v34  ;;  %v2151_v36 = vsel %vm177_vm1, 1.0, %v3356_v34  ;;  %v2152_v37 = vsel %vm178_vm2, 1.0, %v3356_v34  ;;  %v2153_v38 = vsel %vm179_vm3, 1.0, %v3356_v34 }
  0x7d   :  { %v528_v39 = vrot.slane %v2150_v35, 4  ;;  %v534_v40 = vrot.slane %v2151_v36, 4  ;;  %v540_v41 = vrot.slane %v2152_v37, 4  ;;  %v546_v42 = vrot.slane %v2153_v38, 4 }
  0x7e   :  { %vm144_vm4 = vcmp.eq.s32.totalorder %v38_v33, %v2405_v28  ;;  %vm145_vm5 = vcmp.eq.s32.totalorder %v38_v33, %v2408_v29  ;;  %vm146_vm6 = vcmp.eq.s32.totalorder %v38_v33, %v2411_v30  ;;  %vm147_vm7 = vcmp.eq.s32.totalorder %v38_v33, %v2414_v31  ;;  %v101_v11 = vpop.permute.xlu1 %100  ;;  %v45_v24 = vpop.permute.xlu0 %44 }
  0x7f   :  { %v529_v43 = vadd.f32 %v2150_v35, %v528_v39  ;;  %v535_v44 = vadd.f32 %v2151_v36, %v534_v40  ;;  %v541_v45 = vadd.f32 %v2152_v37, %v540_v41  ;;  %v547_v46 = vadd.f32 %v2153_v38, %v546_v42 }
  0x80   :  { %v2118_v47 = vsel %vm144_vm4, 1.0, %v3356_v34  ;;  %v2119_v48 = vsel %vm145_vm5, 1.0, %v3356_v34  ;;  %v2120_v49 = vsel %vm146_vm6, 1.0, %v3356_v34  ;;  %v2121_v50 = vsel %vm147_vm7, 1.0, %v3356_v34 }
  0x81   :  { %v530_v51 = vrot.slane %v529_v43, 2  ;;  %v536_v52 = vrot.slane %v535_v44, 2  ;;  %v542_v53 = vrot.slane %v541_v45, 2  ;;  %v548_v54 = vrot.slane %v547_v46, 2 }
  0x82   :  { %v336_v55 = vrot.slane %v2118_v47, 4  ;;  %v342_v56 = vrot.slane %v2119_v48, 4  ;;  %v348_v57 = vrot.slane %v2120_v49, 4  ;;  %v354_v58 = vrot.slane %v2121_v50, 4 }
  0x83   :  { %v531_v59 = vadd.f32 %v530_v51, %v529_v43  ;;  %v537_v60 = vadd.f32 %v536_v52, %v535_v44  ;;  %v543_v61 = vadd.f32 %v542_v53, %v541_v45  ;;  %v549_v62 = vadd.f32 %v548_v54, %v547_v46 }
  0x84   :  { %v337_v63 = vadd.f32 %v2118_v47, %v336_v55  ;;  %v343_v0 = vadd.f32 %v2119_v48, %v342_v56  ;;  %v349_v1 = vadd.f32 %v2120_v49, %v348_v57  ;;  %v355_v2 = vadd.f32 %v2121_v50, %v354_v58 }
  0x85   :  { %v532_v3 = vrot.slane %v531_v59, 1  ;;  %v538_v4 = vrot.slane %v537_v60, 1  ;;  %v544_v5 = vrot.slane %v543_v61, 1  ;;  %v550_v6 = vrot.slane %v549_v62, 1 }
  0x86   :  { %v338_v7 = vrot.slane %v337_v63, 2  ;;  %v344_v8 = vrot.slane %v343_v0, 2  ;;  %v350_v9 = vrot.slane %v349_v1, 2  ;;  %v356_v10 = vrot.slane %v355_v2, 2 }
  0x87   :  { %vm180_vm8 = vcmp.eq.s32.totalorder %v101_v11, %v2405_v28  ;;  %vm181_vm9 = vcmp.eq.s32.totalorder %v101_v11, %v2408_v29  ;;  %vm182_vm10 = vcmp.eq.s32.totalorder %v101_v11, %v2411_v30  ;;  %vm183_vm11 = vcmp.eq.s32.totalorder %v101_v11, %v2414_v31 }
  0x88   :  { %v339_v12 = vadd.f32 %v338_v7, %v337_v63  ;;  %v345_v13 = vadd.f32 %v344_v8, %v343_v0  ;;  %v351_v14 = vadd.f32 %v350_v9, %v349_v1  ;;  %v357_v15 = vadd.f32 %v356_v10, %v355_v2 }
  0x89   :  { %v2436_v16 = vadd.f32 %v532_v3, %v531_v59  ;;  %v2438_v17 = vadd.f32 %v538_v4, %v537_v60  ;;  %v2440_v18 = vadd.f32 %v544_v5, %v543_v61  ;;  %v2442_v19 = vadd.f32 %v550_v6, %v549_v62  ;;  %v791_v6 = vpop.permute.xlu1 %790 }
  0x8a   :  { %v2154_v20 = vsel %vm180_vm8, 1.0, %v3356_v34  ;;  %v2155_v21 = vsel %vm181_vm9, 1.0, %v3356_v34  ;;  %v2156_v22 = vsel %vm182_vm10, 1.0, %v3356_v34  ;;  %v2157_v23 = vsel %vm183_vm11, 1.0, %v3356_v34 }
  0x8b   :  { %v340_v25 = vrot.slane %v339_v12, 1  ;;  %v346_v26 = vrot.slane %v345_v13, 1  ;;  %v352_v27 = vrot.slane %v351_v14, 1  ;;  %v358_v32 = vrot.slane %v357_v15, 1 }
  0x8c   :  { %v552_v33 = vrot.slane %v2154_v20, 4  ;;  %v558_v35 = vrot.slane %v2155_v21, 4  ;;  %v564_v36 = vrot.slane %v2156_v22, 4  ;;  %v570_v37 = vrot.slane %v2157_v23, 4 }
  0x8d   :  { %vm148_vm12 = vcmp.eq.s32.totalorder %v45_v24, %v2405_v28  ;;  %vm149_vm13 = vcmp.eq.s32.totalorder %v45_v24, %v2408_v29  ;;  %vm150_vm14 = vcmp.eq.s32.totalorder %v45_v24, %v2411_v30  ;;  %vm151_vm15 = vcmp.eq.s32.totalorder %v45_v24, %v2414_v31 }
  0x8e   :  { %v553_v38 = vadd.f32 %v2154_v20, %v552_v33  ;;  %v559_v39 = vadd.f32 %v2155_v21, %v558_v35  ;;  %v565_v40 = vadd.f32 %v2156_v22, %v564_v36  ;;  %v571_v41 = vadd.f32 %v2157_v23, %v570_v37 }
  0x8f   :  { %v2122_v42 = vsel %vm148_vm12, 1.0, %v3356_v34  ;;  %v2123_v43 = vsel %vm149_vm13, 1.0, %v3356_v34  ;;  %v2124_v44 = vsel %vm150_vm14, 1.0, %v3356_v34  ;;  %v2125_v45 = vsel %vm151_vm15, 1.0, %v3356_v34 }
  0x90   :  { %v554_v46 = vrot.slane %v553_v38, 2  ;;  %v560_v47 = vrot.slane %v559_v39, 2  ;;  %v566_v48 = vrot.slane %v565_v40, 2  ;;  %v572_v49 = vrot.slane %v571_v41, 2 }
  0x91   :  { %v360_v50 = vrot.slane %v2122_v42, 4  ;;  %v366_v51 = vrot.slane %v2123_v43, 4  ;;  %v372_v52 = vrot.slane %v2124_v44, 4  ;;  %v378_v53 = vrot.slane %v2125_v45, 4 }
  0x92   :  { %v2456_v54 = vadd.f32 %v554_v46, %v553_v38  ;;  %v2458_v55 = vadd.f32 %v560_v47, %v559_v39  ;;  %v2460_v56 = vadd.f32 %v566_v48, %v565_v40  ;;  %v2462_v57 = vadd.f32 %v572_v49, %v571_v41 }
  0x93   :  { %v361_v58 = vadd.f32 %v2122_v42, %v360_v50  ;;  %v367_v59 = vadd.f32 %v2123_v43, %v366_v51  ;;  %v373_v60 = vadd.f32 %v2124_v44, %v372_v52  ;;  %v379_v61 = vadd.f32 %v2125_v45, %v378_v53 }
  0x94   :  { %v2464_v62 = vadd.f32 %v340_v25, %v339_v12  ;;  %v2466_v63 = vadd.f32 %v346_v26, %v345_v13  ;;  %v2468_v0 = vadd.f32 %v352_v27, %v351_v14  ;;  %v2470_v1 = vadd.f32 %v358_v32, %v357_v15  ;;  %v787_v27 = vpop.permute.xlu0 %786 }
  0x95   :  { %v362_v2 = vrot.slane %v361_v58, 2  ;;  %v368_v3 = vrot.slane %v367_v59, 2  ;;  %v374_v4 = vrot.slane %v373_v60, 2  ;;  %v380_v5 = vrot.slane %v379_v61, 2 }
  0x96   :  { %v556_v7 = vrot.slane %v2456_v54, 1  ;;  %v562_v8 = vrot.slane %v2458_v55, 1  ;;  %v568_v9 = vrot.slane %v2460_v56, 1  ;;  %v574_v10 = vrot.slane %v2462_v57, 1 }
  0x97   :  { %v363_v11 = vadd.f32 %v362_v2, %v361_v58  ;;  %v369_v12 = vadd.f32 %v368_v3, %v367_v59  ;;  %v375_v13 = vadd.f32 %v374_v4, %v373_v60  ;;  %v381_v14 = vadd.f32 %v380_v5, %v379_v61 }
  0x98   :  { %vm852_vm0 = vcmp.eq.s32.totalorder %v791_v6, %v2405_v28  ;;  %vm853_vm1 = vcmp.eq.s32.totalorder %v791_v6, %v2408_v29  ;;  %vm854_vm2 = vcmp.eq.s32.totalorder %v791_v6, %v2411_v30  ;;  %vm855_vm3 = vcmp.eq.s32.totalorder %v791_v6, %v2414_v31 }
  0x99   :  { %v364_v15 = vrot.slane %v363_v11, 1  ;;  %v370_v20 = vrot.slane %v369_v12, 1  ;;  %v376_v21 = vrot.slane %v375_v13, 1  ;;  %v382_v22 = vrot.slane %v381_v14, 1 }
  0x9a   :  { %v2186_v23 = vsel %vm852_vm0, 1.0, %v3356_v34  ;;  %v2187_v24 = vsel %vm853_vm1, 1.0, %v3356_v34  ;;  %v2188_v25 = vsel %vm854_vm2, 1.0, %v3356_v34  ;;  %v2189_v26 = vsel %vm855_vm3, 1.0, %v3356_v34 }
  0x9b   :  { %v365_v32 = vadd.f32 %v364_v15, %v363_v11  ;;  %v371_v33 = vadd.f32 %v370_v20, %v369_v12  ;;  %v377_v35 = vadd.f32 %v376_v21, %v375_v13  ;;  %v383_v36 = vadd.f32 %v382_v22, %v381_v14 }
  0x9c   :  { %v1064_v37 = vrot.slane %v2186_v23, 4  ;;  %v1070_v38 = vrot.slane %v2187_v24, 4  ;;  %v1076_v39 = vrot.slane %v2188_v25, 4  ;;  %v1082_v40 = vrot.slane %v2189_v26, 4 }
  0x9d   :  { %vm848_vm4 = vcmp.eq.s32.totalorder %v787_v27, %v2405_v28  ;;  %vm849_vm5 = vcmp.eq.s32.totalorder %v787_v27, %v2408_v29  ;;  %vm850_vm6 = vcmp.eq.s32.totalorder %v787_v27, %v2411_v30  ;;  %vm851_vm7 = vcmp.eq.s32.totalorder %v787_v27, %v2414_v31 }
  0x9e   :  { %v1065_v41 = vadd.f32 %v2186_v23, %v1064_v37  ;;  %v1071_v42 = vadd.f32 %v2187_v24, %v1070_v38  ;;  %v1077_v43 = vadd.f32 %v2188_v25, %v1076_v39  ;;  %v1083_v44 = vadd.f32 %v2189_v26, %v1082_v40 }
  0x9f   :  { %v2182_v45 = vsel %vm848_vm4, 1.0, %v3356_v34  ;;  %v2183_v46 = vsel %vm849_vm5, 1.0, %v3356_v34  ;;  %v2184_v47 = vsel %vm850_vm6, 1.0, %v3356_v34  ;;  %v2185_v48 = vsel %vm851_vm7, 1.0, %v3356_v34 }
  0xa0   :  { %v1066_v49 = vrot.slane %v1065_v41, 2  ;;  %v1072_v50 = vrot.slane %v1071_v42, 2  ;;  %v1078_v51 = vrot.slane %v1077_v43, 2  ;;  %v1084_v52 = vrot.slane %v1083_v44, 2 }
  0xa1   :  { %v1040_v53 = vrot.slane %v2182_v45, 4  ;;  %v1046_v58 = vrot.slane %v2183_v46, 4  ;;  %v1052_v59 = vrot.slane %v2184_v47, 4  ;;  %v1058_v60 = vrot.slane %v2185_v48, 4 }
  0xa2   :  { %v1067_v61 = vadd.f32 %v1066_v49, %v1065_v41  ;;  %v1073_v2 = vadd.f32 %v1072_v50, %v1071_v42  ;;  %v1079_v3 = vadd.f32 %v1078_v51, %v1077_v43  ;;  %v1085_v4 = vadd.f32 %v1084_v52, %v1083_v44 }
  0xa3   :  { %v1041_v5 = vadd.f32 %v2182_v45, %v1040_v53  ;;  %v1047_v6 = vadd.f32 %v2183_v46, %v1046_v58  ;;  %v1053_v11 = vadd.f32 %v2184_v47, %v1052_v59  ;;  %v1059_v12 = vadd.f32 %v2185_v48, %v1058_v60 }
  0xa4   :  { %v1068_v13 = vrot.slane %v1067_v61, 1  ;;  %v1074_v14 = vrot.slane %v1073_v2, 1  ;;  %v1080_v15 = vrot.slane %v1079_v3, 1  ;;  %v1086_v20 = vrot.slane %v1085_v4, 1 }
  0xa5   :  { %v1042_v21 = vrot.slane %v1041_v5, 2  ;;  %v1048_v22 = vrot.slane %v1047_v6, 2  ;;  %v1054_v23 = vrot.slane %v1053_v11, 2  ;;  %v1060_v24 = vrot.slane %v1059_v12, 2 }
  0xa6   :  { %v1069_v25 = vadd.f32 %v1068_v13, %v1067_v61  ;;  %v1075_v26 = vadd.f32 %v1074_v14, %v1073_v2  ;;  %v1081_v27 = vadd.f32 %v1080_v15, %v1079_v3  ;;  %v1087_v37 = vadd.f32 %v1086_v20, %v1085_v4  ;;  %v823_v2 = vpop.permute.xlu1 %822 }
  0xa7   :  { %v1043_v38 = vadd.f32 %v1042_v21, %v1041_v5  ;;  %v1049_v39 = vadd.f32 %v1048_v22, %v1047_v6  ;;  %v1055_v40 = vadd.f32 %v1054_v23, %v1053_v11  ;;  %v1061_v41 = vadd.f32 %v1060_v24, %v1059_v12 }
  0xa8   :  { %v1428_v42 = vadd.f32 %v1069_v25, %v365_v32  ;;  %v1429_v43 = vadd.f32 %v1075_v26, %v371_v33  ;;  %v1430_v44 = vadd.f32 %v1081_v27, %v377_v35  ;;  %v1431_v45 = vadd.f32 %v1087_v37, %v383_v36 }
  0xa9   :  { %v1044_v46 = vrot.slane %v1043_v38, 1  ;;  %v1050_v47 = vrot.slane %v1049_v39, 1  ;;  %v1056_v48 = vrot.slane %v1055_v40, 1  ;;  %v1062_v49 = vrot.slane %v1061_v41, 1 }
  0xaa   :  { %v1494_v50 = vpack.c.bf16 %v1428_v42, %v1428_v42  ;;  %v1495_v51 = vpack.c.bf16 %v1429_v43, %v1429_v43  ;;  %v1496_v52 = vpack.c.bf16 %v1430_v44, %v1430_v44  ;;  %v1497_v53 = vpack.c.bf16 %v1431_v45, %v1431_v45 }
  0xab   :  { %v1045_v58 = vadd.f32 %v1044_v46, %v1043_v38  ;;  %v1051_v59 = vadd.f32 %v1050_v47, %v1049_v39  ;;  %v1057_v60 = vadd.f32 %v1056_v48, %v1055_v40  ;;  %v1063_v61 = vadd.f32 %v1062_v49, %v1061_v41 }
  0xac   :  { %v2495_v32 = vadd.f32 %v556_v7, %v2456_v54  ;;  %v2500_v33 = vadd.f32 %v562_v8, %v2458_v55  ;;  %v2505_v35 = vadd.f32 %v568_v9, %v2460_v56  ;;  %v2510_v36 = vadd.f32 %v574_v10, %v2462_v57  ;;  %v819_v10 = vpop.permute.xlu0 %818 }
  0xad   :  { %v2513_v3 = vadd.f32 %v1045_v58, %v2464_v62  ;;  %v2516_v54 = vadd.f32 %v1051_v59, %v2466_v63  ;;  %v2519_v7 = vadd.f32 %v1057_v60, %v2468_v0  ;;  %v2522_v55 = vadd.f32 %v1063_v61, %v2470_v1 }
  0xae   :  { %vm884_vm8 = vcmp.eq.s32.totalorder %v823_v2, %v2405_v28  ;;  %vm885_vm9 = vcmp.eq.s32.totalorder %v823_v2, %v2408_v29  ;;  %vm886_vm10 = vcmp.eq.s32.totalorder %v823_v2, %v2411_v30  ;;  %vm887_vm11 = vcmp.eq.s32.totalorder %v823_v2, %v2414_v31 }
  0xaf   :  { %v2528_v56 = vunpack.c.l.b16 %v1494_v50  ;;  %v2530_v57 = vunpack.c.l.b16 %v1495_v51  ;;  %v2532_v62 = vunpack.c.l.b16 %v1496_v52  ;;  %v2534_v63 = vunpack.c.l.b16 %v1497_v53 }
  0xb0   :  { %v2218_v0 = vsel %vm884_vm8, 1.0, %v3356_v34  ;;  %v2219_v1 = vsel %vm885_vm9, 1.0, %v3356_v34  ;;  %v2220_v8 = vsel %vm886_vm10, 1.0, %v3356_v34  ;;  %v2221_v9 = vsel %vm887_vm11, 1.0, %v3356_v34 }
  0xb1   :  { %3372 = vst [vmem:[#allocation6_spill] sm:$0xff] %v2528_v56  ;;  %3373 = vst [vmem:[#allocation7_spill] sm:$0xff] %v2532_v62  ;;  %v1490_v4 = vpack.c.bf16 %v2513_v3, %v2513_v3  ;;  %v1491_v5 = vpack.c.bf16 %v2516_v54, %v2516_v54  ;;  %v1492_v6 = vpack.c.bf16 %v2519_v7, %v2519_v7  ;;  %v1256_v12 = vrot.slane %v2218_v0, 4 }
  0xb2   :  { %3374 = vst [vmem:[#allocation8_spill] sm:$0xff] %v2534_v63  ;;  %v1493_v11 = vpack.c.bf16 %v2522_v55, %v2522_v55  ;;  %v1262_v13 = vrot.slane %v2219_v1, 4  ;;  %v1268_v14 = vrot.slane %v2220_v8, 4  ;;  %v1274_v15 = vrot.slane %v2221_v9, 4 }
  0xb3   :  { %vm880_vm12 = vcmp.eq.s32.totalorder %v819_v10, %v2405_v28  ;;  %vm881_vm13 = vcmp.eq.s32.totalorder %v819_v10, %v2408_v29  ;;  %vm882_vm14 = vcmp.eq.s32.totalorder %v819_v10, %v2411_v30  ;;  %vm883_vm15 = vcmp.eq.s32.totalorder %v819_v10, %v2414_v31 }
  0xb4   :  { %v1257_v20 = vadd.f32 %v2218_v0, %v1256_v12  ;;  %v1263_v21 = vadd.f32 %v2219_v1, %v1262_v13  ;;  %v1269_v22 = vadd.f32 %v2220_v8, %v1268_v14  ;;  %v1275_v23 = vadd.f32 %v2221_v9, %v1274_v15 }
  0xb5   :  { %v2214_v24 = vsel %vm880_vm12, 1.0, %v3356_v34  ;;  %v2215_v25 = vsel %vm881_vm13, 1.0, %v3356_v34  ;;  %v2216_v26 = vsel %vm882_vm14, 1.0, %v3356_v34  ;;  %v2217_v27 = vsel %vm883_vm15, 1.0, %v3356_v34 }
  0xb6   :  { %v1258_v37 = vrot.slane %v1257_v20, 2  ;;  %v1264_v38 = vrot.slane %v1263_v21, 2  ;;  %v1270_v39 = vrot.slane %v1269_v22, 2  ;;  %v1276_v40 = vrot.slane %v1275_v23, 2 }
  0xb7   :  { %v1232_v41 = vrot.slane %v2214_v24, 4  ;;  %v1238_v42 = vrot.slane %v2215_v25, 4  ;;  %v1244_v43 = vrot.slane %v2216_v26, 4  ;;  %v1250_v44 = vrot.slane %v2217_v27, 4 }
  0xb8   :  { %v1259_v45 = vadd.f32 %v1258_v37, %v1257_v20  ;;  %v1265_v46 = vadd.f32 %v1264_v38, %v1263_v21  ;;  %v1271_v47 = vadd.f32 %v1270_v39, %v1269_v22  ;;  %v1277_v48 = vadd.f32 %v1276_v40, %v1275_v23 }
  0xb9   :  { %v1233_v49 = vadd.f32 %v2214_v24, %v1232_v41  ;;  %v1239_v50 = vadd.f32 %v2215_v25, %v1238_v42  ;;  %v1245_v51 = vadd.f32 %v2216_v26, %v1244_v43  ;;  %v1251_v52 = vadd.f32 %v2217_v27, %v1250_v44 }
  0xba   :  { %v1260_v53 = vrot.slane %v1259_v45, 1  ;;  %v1266_v58 = vrot.slane %v1265_v46, 1  ;;  %v1272_v59 = vrot.slane %v1271_v47, 1  ;;  %v1278_v60 = vrot.slane %v1277_v48, 1 }
  0xbb   :  { %v1234_v61 = vrot.slane %v1233_v49, 2  ;;  %v1240_v2 = vrot.slane %v1239_v50, 2  ;;  %v1246_v0 = vrot.slane %v1245_v51, 2  ;;  %v1252_v1 = vrot.slane %v1251_v52, 2 }
  0xbc   :  { %v1261_v8 = vadd.f32 %v1260_v53, %v1259_v45  ;;  %v1267_v9 = vadd.f32 %v1266_v58, %v1265_v46  ;;  %v1273_v10 = vadd.f32 %v1272_v59, %v1271_v47  ;;  %v1279_v12 = vadd.f32 %v1278_v60, %v1277_v48  ;;  %v108_v46 = vpop.permute.xlu1 %107 }
  0xbd   :  { %v1235_v13 = vadd.f32 %v1234_v61, %v1233_v49  ;;  %v1241_v14 = vadd.f32 %v1240_v2, %v1239_v50  ;;  %v1247_v15 = vadd.f32 %v1246_v0, %v1245_v51  ;;  %v1253_v20 = vadd.f32 %v1252_v1, %v1251_v52 }
  0xbe   :  { %v1460_v21 = vadd.f32 %v1261_v8, %v2495_v32  ;;  %v1461_v22 = vadd.f32 %v1267_v9, %v2500_v33  ;;  %v1462_v23 = vadd.f32 %v1273_v10, %v2505_v35  ;;  %v1463_v24 = vadd.f32 %v1279_v12, %v2510_v36 }
  0xbf   :  { %v1236_v25 = vrot.slane %v1235_v13, 1  ;;  %v1242_v26 = vrot.slane %v1241_v14, 1  ;;  %v1248_v27 = vrot.slane %v1247_v15, 1  ;;  %v1254_v37 = vrot.slane %v1253_v20, 1 }
  0xc0   :  { %v1526_v38 = vpack.c.bf16 %v1460_v21, %v1460_v21  ;;  %v1527_v39 = vpack.c.bf16 %v1461_v22, %v1461_v22  ;;  %v1528_v40 = vpack.c.bf16 %v1462_v23, %v1462_v23  ;;  %v1529_v41 = vpack.c.bf16 %v1463_v24, %v1463_v24 }
  0xc1   :  { %v1237_v42 = vadd.f32 %v1236_v25, %v1235_v13  ;;  %v1243_v43 = vadd.f32 %v1242_v26, %v1241_v14  ;;  %v1249_v44 = vadd.f32 %v1248_v27, %v1247_v15  ;;  %v1255_v45 = vadd.f32 %v1254_v37, %v1253_v20 }
  0xc2   :  { %v2563_v32 = vunpack.c.l.b16 %v1490_v4  ;;  %v2568_v33 = vunpack.c.l.b16 %v1491_v5  ;;  %v2573_v35 = vunpack.c.l.b16 %v1492_v6  ;;  %v2578_v36 = vunpack.c.l.b16 %v1493_v11  ;;  %v52_v11 = vpop.permute.xlu0 %51 }
  0xc3   :  { %v1456_v47 = vadd.f32 %v1237_v42, %v2436_v16  ;;  %v2582_v3 = vadd.f32 %v1243_v43, %v2438_v17  ;;  %v2585_v4 = vadd.f32 %v1249_v44, %v2440_v18  ;;  %v2588_v54 = vadd.f32 %v1255_v45, %v2442_v19 }
  0xc4   :  { %3375 = vst [vmem:[#allocation9_spill] sm:$0xff] %v2563_v32  ;;  %3376 = vst [vmem:[#allocation10_spill] sm:$0xff] %v2573_v35  ;;  %vm184_vm0 = vcmp.eq.s32.totalorder %v108_v46, %v2405_v28  ;;  %vm185_vm1 = vcmp.eq.s32.totalorder %v108_v46, %v2408_v29  ;;  %vm186_vm2 = vcmp.eq.s32.totalorder %v108_v46, %v2411_v30  ;;  %v2594_v7 = vunpack.c.l.b16 %v1526_v38  ;;  %v2334_v35 = vld [vmem:[%s3354_s1 + $0x68] sm:$0xff]  }
  0xc5   :  { %3377 = vst [vmem:[#allocation11_spill] sm:$0xff] %v2578_v36  ;;  %vm187_vm3 = vcmp.eq.s32.totalorder %v108_v46, %v2414_v31  ;;  %v2596_v16 = vunpack.c.l.b16 %v1527_v39  ;;  %v2598_v17 = vunpack.c.l.b16 %v1528_v40  ;;  %v2600_v55 = vunpack.c.l.b16 %v1529_v41 }
  0xc6   :  { %3378 = vst [vmem:[#allocation12_spill] sm:$0xff] %v2594_v7  ;;  %v2158_v18 = vsel %vm184_vm0, 1.0, %v3356_v34  ;;  %v2159_v19 = vsel %vm185_vm1, 1.0, %v3356_v34  ;;  %v2160_v5 = vsel %vm186_vm2, 1.0, %v3356_v34  ;;  %v2161_v6 = vsel %vm187_vm3, 1.0, %v3356_v34 }
  0xc7   :  { %3379 = vst [vmem:[#allocation13_spill] sm:$0xff] %v2598_v17  ;;  %3380 = vst [vmem:[#allocation14_spill] sm:$0xff] %v2600_v55  ;;  %v1522_v48 = vpack.c.bf16 %v1456_v47, %v1456_v47  ;;  %v576_v52 = vrot.slane %v2158_v18, 4  ;;  %v582_v53 = vrot.slane %v2159_v19, 4  ;;  %v588_v58 = vrot.slane %v2160_v5, 4 }
  0xc8   :  { %v594_v59 = vrot.slane %v2161_v6, 4  ;;  %vm152_vm4 = vcmp.eq.s32.totalorder %v52_v11, %v2405_v28  ;;  %vm153_vm5 = vcmp.eq.s32.totalorder %v52_v11, %v2408_v29  ;;  %vm154_vm6 = vcmp.eq.s32.totalorder %v52_v11, %v2411_v30 }
  0xc9   :  { %vm155_vm7 = vcmp.eq.s32.totalorder %v52_v11, %v2414_v31  ;;  %v577_v60 = vadd.f32 %v2158_v18, %v576_v52  ;;  %v583_v61 = vadd.f32 %v2159_v19, %v582_v53  ;;  %v589_v2 = vadd.f32 %v2160_v5, %v588_v58  ;;  %v827_v19 = vpop.permute.xlu1 %826 }
  0xca   :  { %v595_v0 = vadd.f32 %v2161_v6, %v594_v59  ;;  %v2126_v1 = vsel %vm152_vm4, 1.0, %v3356_v34  ;;  %v2127_v8 = vsel %vm153_vm5, 1.0, %v3356_v34  ;;  %v2128_v9 = vsel %vm154_vm6, 1.0, %v3356_v34 }
  0xcb   :  { %v2129_v10 = vsel %vm155_vm7, 1.0, %v3356_v34  ;;  %v578_v12 = vrot.slane %v577_v60, 2  ;;  %v584_v13 = vrot.slane %v583_v61, 2  ;;  %v590_v14 = vrot.slane %v589_v2, 2 }
  0xcc   :  { %v596_v15 = vrot.slane %v595_v0, 2  ;;  %v384_v20 = vrot.slane %v2126_v1, 4  ;;  %v390_v21 = vrot.slane %v2127_v8, 4  ;;  %v396_v22 = vrot.slane %v2128_v9, 4 }
  0xcd   :  { %v402_v23 = vrot.slane %v2129_v10, 4  ;;  %v579_v24 = vadd.f32 %v578_v12, %v577_v60  ;;  %v585_v25 = vadd.f32 %v584_v13, %v583_v61  ;;  %v591_v26 = vadd.f32 %v590_v14, %v589_v2  ;;  %v795_v12 = vpop.permute.xlu0 %794 }
  0xce   :  { %v597_v27 = vadd.f32 %v596_v15, %v595_v0  ;;  %v385_v37 = vadd.f32 %v2126_v1, %v384_v20  ;;  %v391_v38 = vadd.f32 %v2127_v8, %v390_v21  ;;  %v397_v39 = vadd.f32 %v2128_v9, %v396_v22 }
  0xcf   :  { %v403_v40 = vadd.f32 %v2129_v10, %v402_v23  ;;  %v580_v41 = vrot.slane %v579_v24, 1  ;;  %v586_v42 = vrot.slane %v585_v25, 1  ;;  %v592_v43 = vrot.slane %v591_v26, 1 }
  0xd0   :  { %v598_v44 = vrot.slane %v597_v27, 1  ;;  %v386_v45 = vrot.slane %v385_v37, 2  ;;  %v392_v46 = vrot.slane %v391_v38, 2  ;;  %v398_v47 = vrot.slane %v397_v39, 2 }
  0xd1   :  { %v404_v18 = vrot.slane %v403_v40, 2  ;;  %v2620_v5 = vunpack.c.l.b16 %v1522_v48  ;;  %v2622_v6 = vadd.f32 %v580_v41, %v579_v24  ;;  %v2624_v11 = vadd.f32 %v586_v42, %v585_v25 }
  0xd2   :  { %v2626_v52 = vadd.f32 %v592_v43, %v591_v26  ;;  %v387_v53 = vadd.f32 %v386_v45, %v385_v37  ;;  %v393_v58 = vadd.f32 %v392_v46, %v391_v38  ;;  %v399_v59 = vadd.f32 %v398_v47, %v397_v39 }
  0xd3   :  { %3381 = vst [vmem:[#allocation15_spill] sm:$0xff] %v2620_v5  ;;  %v2628_v60 = vadd.f32 %v404_v18, %v403_v40  ;;  %vm888_vm8 = vcmp.eq.s32.totalorder %v827_v19, %v2405_v28  ;;  %vm889_vm9 = vcmp.eq.s32.totalorder %v827_v19, %v2408_v29  ;;  %vm890_vm10 = vcmp.eq.s32.totalorder %v827_v19, %v2411_v30 }
  0xd4   :  { %vm891_vm11 = vcmp.eq.s32.totalorder %v827_v19, %v2414_v31  ;;  %v2634_v48 = vadd.f32 %v598_v44, %v597_v27  ;;  %v388_v61 = vrot.slane %v387_v53, 1  ;;  %v394_v2 = vrot.slane %v393_v58, 1 }
  0xd5   :  { %v400_v0 = vrot.slane %v399_v59, 1  ;;  %v2222_v1 = vsel %vm888_vm8, 1.0, %v3356_v34  ;;  %v2223_v8 = vsel %vm889_vm9, 1.0, %v3356_v34  ;;  %v2224_v9 = vsel %vm890_vm10, 1.0, %v3356_v34 }
  0xd6   :  { %v2225_v10 = vsel %vm891_vm11, 1.0, %v3356_v34  ;;  %v2640_v13 = vadd.f32 %v388_v61, %v387_v53  ;;  %v2642_v14 = vadd.f32 %v394_v2, %v393_v58  ;;  %v406_v20 = vrot.slane %v2628_v60, 1 }
  0xd7   :  { %v2644_v15 = vadd.f32 %v400_v0, %v399_v59  ;;  %v1280_v21 = vrot.slane %v2222_v1, 4  ;;  %v1286_v22 = vrot.slane %v2223_v8, 4  ;;  %v1292_v23 = vrot.slane %v2224_v9, 4 }
  0xd8   :  { %v1298_v24 = vrot.slane %v2225_v10, 4  ;;  %vm856_vm12 = vcmp.eq.s32.totalorder %v795_v12, %v2405_v28  ;;  %vm857_vm13 = vcmp.eq.s32.totalorder %v795_v12, %v2408_v29  ;;  %vm858_vm14 = vcmp.eq.s32.totalorder %v795_v12, %v2411_v30 }
  0xd9   :  { %vm859_vm15 = vcmp.eq.s32.totalorder %v795_v12, %v2414_v31  ;;  %v1281_v25 = vadd.f32 %v2222_v1, %v1280_v21  ;;  %v1287_v26 = vadd.f32 %v2223_v8, %v1286_v22  ;;  %v1293_v27 = vadd.f32 %v2224_v9, %v1292_v23 }
  0xda   :  { %v1299_v37 = vadd.f32 %v2225_v10, %v1298_v24  ;;  %v2190_v38 = vsel %vm856_vm12, 1.0, %v3356_v34  ;;  %v2191_v39 = vsel %vm857_vm13, 1.0, %v3356_v34  ;;  %v2192_v40 = vsel %vm858_vm14, 1.0, %v3356_v34 }
  0xdb   :  { %v2193_v41 = vsel %vm859_vm15, 1.0, %v3356_v34  ;;  %v1282_v42 = vrot.slane %v1281_v25, 2  ;;  %v1288_v43 = vrot.slane %v1287_v26, 2  ;;  %v1294_v44 = vrot.slane %v1293_v27, 2 }
  0xdc   :  { %v1300_v45 = vrot.slane %v1299_v37, 2  ;;  %v1088_v46 = vrot.slane %v2190_v38, 4  ;;  %v1094_v47 = vrot.slane %v2191_v39, 4  ;;  %v1100_v18 = vrot.slane %v2192_v40, 4 }
  0xdd   :  { %v1106_v19 = vrot.slane %v2193_v41, 4  ;;  %v1283_v53 = vadd.f32 %v1282_v42, %v1281_v25  ;;  %v1289_v58 = vadd.f32 %v1288_v43, %v1287_v26  ;;  %v1295_v59 = vadd.f32 %v1294_v44, %v1293_v27 }
  0xde   :  { %v1301_v61 = vadd.f32 %v1300_v45, %v1299_v37  ;;  %v1089_v2 = vadd.f32 %v2190_v38, %v1088_v46  ;;  %v1095_v0 = vadd.f32 %v2191_v39, %v1094_v47  ;;  %v1101_v1 = vadd.f32 %v2192_v40, %v1100_v18 }
  0xdf   :  { %v1107_v8 = vadd.f32 %v2193_v41, %v1106_v19  ;;  %v1284_v9 = vrot.slane %v1283_v53, 1  ;;  %v1290_v10 = vrot.slane %v1289_v58, 1  ;;  %v1296_v12 = vrot.slane %v1295_v59, 1 }
  0xe0   :  { %v1302_v21 = vrot.slane %v1301_v61, 1  ;;  %v1090_v22 = vrot.slane %v1089_v2, 2  ;;  %v1096_v23 = vrot.slane %v1095_v0, 2  ;;  %v1102_v24 = vrot.slane %v1101_v1, 2 }
  0xe1   :  { %v1108_v34 = vrot.slane %v1107_v8, 2  ;;  %v1285_v51 = vadd.f32 %v1284_v9, %v1283_v53  ;;  %v1291_v50 = vadd.f32 %v1290_v10, %v1289_v58  ;;  %v1297_v49 = vadd.f32 %v1296_v12, %v1295_v59 }
  0xe2   :  { %v1303_v17 = vadd.f32 %v1302_v21, %v1301_v61  ;;  %v1091_v25 = vadd.f32 %v1090_v22, %v1089_v2  ;;  %v1097_v26 = vadd.f32 %v1096_v23, %v1095_v0  ;;  %v1103_v27 = vadd.f32 %v1102_v24, %v1101_v1  ;;  %v2328_v0 = vld [vmem:[%s3354_s1 + $0x38] sm:$0xff]   ;;  %v59_v22 = vpop.permute.xlu0 %58 }
  0xe3   :  { %v1109_v37 = vadd.f32 %v1108_v34, %v1107_v8  ;;  %v1464_v38 = vadd.f32 %v1285_v51, %v2622_v6  ;;  %v1465_v39 = vadd.f32 %v1291_v50, %v2624_v11  ;;  %v1466_v40 = vadd.f32 %v1297_v49, %v2626_v52  ;;  %v115_v51 = vpop.permute.xlu1 %114  ;;  %v2329_v1 = vld [vmem:[%s3354_s1 + $0xb8] sm:$0xff]  }
  0xe4   :  { %v1467_v41 = vadd.f32 %v1303_v17, %v2634_v48  ;;  %v1092_v42 = vrot.slane %v1091_v25, 1  ;;  %v1098_v43 = vrot.slane %v1097_v26, 1  ;;  %v1104_v44 = vrot.slane %v1103_v27, 1 }
  0xe5   :  { %v1110_v45 = vrot.slane %v1109_v37, 1  ;;  %v407_v46 = vadd.f32 %v406_v20, %v2628_v60  ;;  %v1530_v47 = vpack.c.bf16 %v1464_v38, %v1464_v38  ;;  %v1531_v18 = vpack.c.bf16 %v1465_v39, %v1465_v39 }
  0xe6   :  { %v1532_v19 = vpack.c.bf16 %v1466_v40, %v1466_v40  ;;  %v1093_v53 = vadd.f32 %v1092_v42, %v1091_v25  ;;  %v1099_v58 = vadd.f32 %v1098_v43, %v1097_v26  ;;  %v1105_v34 = vadd.f32 %v1104_v44, %v1103_v27 }
  0xe7   :  { %v1111_v59 = vadd.f32 %v1110_v45, %v1109_v37  ;;  %v3382_v50 = vpack.c.bf16 %v2582_v3, %v2582_v3  ;;  %v3383_v17 = vpack.c.bf16 %v2585_v4, %v2585_v4  ;;  %v3385_v11 = vpack.c.bf16 %v2588_v54, %v2588_v54  ;;  %v2326_v4 = vld [vmem:[%s3354_s1 + $0x78] sm:$0xff]  }
  0xe8   :  { %v1533_v60 = vpack.c.bf16 %v1467_v41, %v1467_v41  ;;  %v2676_v48 = vadd.f32 %v1093_v53, %v2640_v13  ;;  %v2679_v20 = vadd.f32 %v1099_v58, %v2642_v14  ;;  %v2682_v3 = vadd.f32 %v1105_v34, %v2644_v15  ;;  %v2327_v54 = vld [vmem:[%s3354_s1 + $0xf8] sm:$0xff]   ;;  %2278 = vmatprep.subr.bf16.mxu0 %v2326_v4 }
  0xe9   :  { %v2663_v49 = vunpack.c.l.b16 %v3382_v50  ;;  %v2668_v6 = vunpack.c.l.b16 %v3383_v17  ;;  %v2673_v52 = vunpack.c.l.b16 %v3385_v11  ;;  %v2684_v61 = vadd.f32 %v1111_v59, %v407_v46  ;;  %2300 = vmatprep.subr.bf16.mxu1 %v2327_v54  ;;  %2279 = vmatpush3.bf16.msra.mxu0 %v2328_v0 }
  0xea   :  { %vm188_vm0 = vcmp.eq.s32.totalorder %v115_v51, %v2405_v28  ;;  %vm189_vm1 = vcmp.eq.s32.totalorder %v115_v51, %v2408_v29  ;;  %vm190_vm2 = vcmp.eq.s32.totalorder %v115_v51, %v2411_v30  ;;  %vm191_vm3 = vcmp.eq.s32.totalorder %v115_v51, %v2414_v31  ;;  %2301 = vmatpush3.bf16.msra.mxu1 %v2329_v1 }
  0xeb   :  { %3384 = vst [vmem:[#allocation16_spill] sm:$0xff] %v2668_v6  ;;  %3386 = vst [vmem:[#allocation17_spill] sm:$0xff] %v2673_v52  ;;  %v2696_v13 = vunpack.c.l.b16 %v1530_v47  ;;  %v2698_v14 = vunpack.c.l.b16 %v1531_v18  ;;  %v2700_v15 = vunpack.c.l.b16 %v1532_v19  ;;  %v1498_v2 = vpack.c.bf16 %v2676_v48, %v2676_v48 }
  0xec   :  { %v3389_v8 = vmov 0.0   ;;  %v2714_v23 = vunpack.c.l.b16 %v1533_v60  ;;  %v1499_v24 = vpack.c.bf16 %v2679_v20, %v2679_v20  ;;  %v1500_v25 = vpack.c.bf16 %v2682_v3, %v2682_v3 }
  0xed   :  { %3387 = vst [vmem:[#allocation18_spill] sm:$0xff] %v2696_v13  ;;  %3388 = vst [vmem:[#allocation19_spill] sm:$0xff] %v2700_v15  ;;  %v2162_v9 = vsel %vm188_vm0, 1.0, %v3389_v8  ;;  %v2163_v10 = vsel %vm189_vm1, 1.0, %v3389_v8  ;;  %v2164_v12 = vsel %vm190_vm2, 1.0, %v3389_v8  ;;  %v2165_v21 = vsel %vm191_vm3, 1.0, %v3389_v8 }
  0xee   :  { %3390 = vst [vmem:[#allocation20_spill] sm:$0xff] %v2714_v23  ;;  %v1501_v26 = vpack.c.bf16 %v2684_v61, %v2684_v61  ;;  %v600_v27 = vrot.slane %v2162_v9, 4  ;;  %v606_v37 = vrot.slane %v2163_v10, 4  ;;  %v612_v38 = vrot.slane %v2164_v12, 4 }
  0xef   :  { %v618_v39 = vrot.slane %v2165_v21, 4  ;;  %vm156_vm4 = vcmp.eq.s32.totalorder %v59_v22, %v2405_v28  ;;  %vm157_vm5 = vcmp.eq.s32.totalorder %v59_v22, %v2408_v29  ;;  %vm158_vm6 = vcmp.eq.s32.totalorder %v59_v22, %v2411_v30 }
  0xf0   :  { %vm159_vm7 = vcmp.eq.s32.totalorder %v59_v22, %v2414_v31  ;;  %v601_v40 = vadd.f32 %v2162_v9, %v600_v27  ;;  %v607_v41 = vadd.f32 %v2163_v10, %v606_v37  ;;  %v613_v42 = vadd.f32 %v2164_v12, %v612_v38  ;;  %v831_v27 = vpop.permute.xlu1 %830 }
  0xf1   :  { %v619_v43 = vadd.f32 %v2165_v21, %v618_v39  ;;  %v2130_v44 = vsel %vm156_vm4, 1.0, %v3389_v8  ;;  %v2131_v45 = vsel %vm157_vm5, 1.0, %v3389_v8  ;;  %v2132_v46 = vsel %vm158_vm6, 1.0, %v3389_v8 }
  0xf2   :  { %v2133_v47 = vsel %vm159_vm7, 1.0, %v3389_v8  ;;  %v602_v18 = vrot.slane %v601_v40, 2  ;;  %v608_v19 = vrot.slane %v607_v41, 2  ;;  %v614_v53 = vrot.slane %v613_v42, 2 }
  0xf3   :  { %v620_v58 = vrot.slane %v619_v43, 2  ;;  %v408_v34 = vrot.slane %v2130_v44, 4  ;;  %v414_v59 = vrot.slane %v2131_v45, 4  ;;  %v420_v51 = vrot.slane %v2132_v46, 4 }
  0xf4   :  { %v426_v50 = vrot.slane %v2133_v47, 4  ;;  %v603_v17 = vadd.f32 %v602_v18, %v601_v40  ;;  %v609_v11 = vadd.f32 %v608_v19, %v607_v41  ;;  %v615_v60 = vadd.f32 %v614_v53, %v613_v42 }
  0xf5   :  { %v621_v48 = vadd.f32 %v620_v58, %v619_v43  ;;  %v409_v20 = vadd.f32 %v2130_v44, %v408_v34  ;;  %v415_v3 = vadd.f32 %v2131_v45, %v414_v59  ;;  %v421_v61 = vadd.f32 %v2132_v46, %v420_v51  ;;  %v2330_v45 = vld [vmem:[%s3354_s1 + $0x70] sm:$0xff]   ;;  %v799_v51 = vpop.permute.xlu0 %798 }
  0xf6   :  { %v427_v4 = vadd.f32 %v2133_v47, %v426_v50  ;;  %v604_v54 = vrot.slane %v603_v17, 1  ;;  %v610_v0 = vrot.slane %v609_v11, 1  ;;  %v616_v1 = vrot.slane %v615_v60, 1  ;;  %2280 = vmatprep.subr.bf16.mxu0 %v2330_v45 }
  0xf7   :  { %v622_v9 = vrot.slane %v621_v48, 1  ;;  %v410_v10 = vrot.slane %v409_v20, 2  ;;  %v416_v12 = vrot.slane %v415_v3, 2  ;;  %v422_v21 = vrot.slane %v421_v61, 2 }
  0xf8   :  { %v428_v22 = vrot.slane %v427_v4, 2  ;;  %v2730_v37 = vunpack.c.l.b16 %v1498_v2  ;;  %v2732_v38 = vunpack.c.l.b16 %v1499_v24  ;;  %v2734_v39 = vunpack.c.l.b16 %v1500_v25  ;;  %v2331_v2 = vld [vmem:[%s3354_s1 + $0xf0] sm:$0xff]  }
  0xf9   :  { %v2736_v40 = vadd.f32 %v604_v54, %v603_v17  ;;  %v2738_v41 = vadd.f32 %v410_v10, %v409_v20  ;;  %v2740_v42 = vadd.f32 %v416_v12, %v415_v3  ;;  %v2742_v43 = vadd.f32 %v422_v21, %v421_v61  ;;  %v2332_v24 = vld [vmem:[%s3354_s1 + $0x30] sm:$0xff]   ;;  %2302 = vmatprep.subr.bf16.mxu1 %v2331_v2 }
  0xfa   :  { %3391 = vst [vmem:[#allocation21_spill] sm:$0xff] %v2730_v37  ;;  %3392 = vst [vmem:[#allocation22_spill] sm:$0xff] %v2734_v39  ;;  %v2744_v44 = vadd.f32 %v428_v22, %v427_v4  ;;  %vm892_vm8 = vcmp.eq.s32.totalorder %v831_v27, %v2405_v28  ;;  %vm893_vm9 = vcmp.eq.s32.totalorder %v831_v27, %v2408_v29  ;;  %v2333_v25 = vld [vmem:[%s3354_s1 + $0xb0] sm:$0xff]   ;;  %v2762_v46 = vunpack.c.l.b16 %v1501_v26 }
  0xfb   :  { %vm894_vm10 = vcmp.eq.s32.totalorder %v831_v27, %v2411_v30  ;;  %vm895_vm11 = vcmp.eq.s32.totalorder %v831_v27, %v2414_v31  ;;  %v2764_v47 = vadd.f32 %v610_v0, %v609_v11  ;;  %v2766_v18 = vadd.f32 %v616_v1, %v615_v60  ;;  %2281 = vmatpush3.bf16.msra.mxu0 %v2332_v24 }
  0xfc   :  { %3393 = vst [vmem:[#allocation23_spill] sm:$0xff] %v2762_v46  ;;  %v2768_v19 = vadd.f32 %v622_v9, %v621_v48  ;;  %v2226_v53 = vsel %vm892_vm8, 1.0, %v3389_v8  ;;  %v2227_v58 = vsel %vm893_vm9, 1.0, %v3389_v8  ;;  %v2228_v34 = vsel %vm894_vm10, 1.0, %v3389_v8  ;;  %2303 = vmatpush3.bf16.msra.mxu1 %v2333_v25  ;;  %2282 = vmatprep.subr.bf16.mxu0 %v2334_v35  ;;  %v2339_v35 = vld [vmem:[%s3354_s1 + $0xe0] sm:$0xff]  }
  0xfd   :  { %v2229_v59 = vsel %vm895_vm11, 1.0, %v3389_v8  ;;  %v1304_v60 = vrot.slane %v2226_v53, 4  ;;  %v1310_v48 = vrot.slane %v2227_v58, 4  ;;  %v1316_v20 = vrot.slane %v2228_v34, 4 }
  0xfe   :  { %v1322_v3 = vrot.slane %v2229_v59, 4  ;;  %vm860_vm12 = vcmp.eq.s32.totalorder %v799_v51, %v2405_v28  ;;  %vm861_vm13 = vcmp.eq.s32.totalorder %v799_v51, %v2408_v29  ;;  %vm862_vm14 = vcmp.eq.s32.totalorder %v799_v51, %v2411_v30 }
  0xff   :  { %vm863_vm15 = vcmp.eq.s32.totalorder %v799_v51, %v2414_v31  ;;  %v1305_v61 = vadd.f32 %v2226_v53, %v1304_v60  ;;  %v1311_v4 = vadd.f32 %v2227_v58, %v1310_v48  ;;  %v1317_v54 = vadd.f32 %v2228_v34, %v1316_v20 }
 0x100   :  { %v1323_v0 = vadd.f32 %v2229_v59, %v1322_v3  ;;  %v2194_v1 = vsel %vm860_vm12, 1.0, %v3389_v8  ;;  %v2195_v9 = vsel %vm861_vm13, 1.0, %v3389_v8  ;;  %v2196_v10 = vsel %vm862_vm14, 1.0, %v3389_v8 }
 0x101   :  { %v2197_v12 = vsel %vm863_vm15, 1.0, %v3389_v8  ;;  %v1306_v21 = vrot.slane %v1305_v61, 2  ;;  %v1312_v22 = vrot.slane %v1311_v4, 2  ;;  %v1318_v27 = vrot.slane %v1317_v54, 2 }
 0x102   :  { %v1324_v45 = vrot.slane %v1323_v0, 2  ;;  %v1112_v2 = vrot.slane %v2194_v1, 4  ;;  %v1118_v24 = vrot.slane %v2195_v9, 4  ;;  %v1124_v25 = vrot.slane %v2196_v10, 4 }
 0x103   :  { %v1130_v51 = vrot.slane %v2197_v12, 4  ;;  %v1307_v53 = vadd.f32 %v1306_v21, %v1305_v61  ;;  %v1313_v58 = vadd.f32 %v1312_v22, %v1311_v4  ;;  %v1319_v34 = vadd.f32 %v1318_v27, %v1317_v54  ;;  %v2335_v61 = vld [vmem:[%s3354_s1 + $0xe8] sm:$0xff]  }
 0x104   :  { %v1325_v59 = vadd.f32 %v1324_v45, %v1323_v0  ;;  %v1113_v60 = vadd.f32 %v2194_v1, %v1112_v2  ;;  %v1119_v48 = vadd.f32 %v2195_v9, %v1118_v24  ;;  %v1125_v20 = vadd.f32 %v2196_v10, %v1124_v25  ;;  %v2336_v9 = vld [vmem:[%s3354_s1 + $0x28] sm:$0xff]   ;;  %2304 = vmatprep.subr.bf16.mxu1 %v2335_v61 }
 0x105   :  { %v1131_v3 = vadd.f32 %v2197_v12, %v1130_v51  ;;  %v1308_v11 = vrot.slane %v1307_v53, 1  ;;  %v1314_v50 = vrot.slane %v1313_v58, 1  ;;  %v1320_v17 = vrot.slane %v1319_v34, 1  ;;  %v2337_v10 = vld [vmem:[%s3354_s1 + $0xa8] sm:$0xff]   ;;  %2283 = vmatpush3.bf16.msra.mxu0 %v2336_v9  ;;  %v2340_v51 = vld [vmem:[%s3354_s1 + $0x20] sm:$0xff]   ;;  %v2344_v9 = vld [vmem:[%s3354_s1 + $0x18] sm:$0xff]  }
 0x106   :  { %v1326_v26 = vrot.slane %v1325_v59, 1  ;;  %v1114_v15 = vrot.slane %v1113_v60, 2  ;;  %v1120_v6 = vrot.slane %v1119_v48, 2  ;;  %v1126_v39 = vrot.slane %v1125_v20, 2  ;;  %2305 = vmatpush3.bf16.msra.mxu1 %v2337_v10  ;;  %v2345_v10 = vld [vmem:[%s3354_s1 + $0x98] sm:$0xff]  }
 0x107   :  { %v1132_v62 = vrot.slane %v1131_v3, 2  ;;  %v1309_v4 = vadd.f32 %v1308_v11, %v1307_v53  ;;  %v1315_v54 = vadd.f32 %v1314_v50, %v1313_v58  ;;  %v1321_v0 = vadd.f32 %v1320_v17, %v1319_v34  ;;  %v2341_v53 = vld [vmem:[%s3354_s1 + $0xa0] sm:$0xff]   ;;  %2306 = vmatprep.subr.bf16.mxu1 %v2339_v35 }
 0x108   :  { %v1327_v1 = vadd.f32 %v1326_v26, %v1325_v59  ;;  %v1115_v12 = vadd.f32 %v1114_v15, %v1113_v60  ;;  %v1121_v21 = vadd.f32 %v1120_v6, %v1119_v48  ;;  %v1127_v22 = vadd.f32 %v1126_v39, %v1125_v20  ;;  %v122_v15 = vpop.permute.xlu1 %121 }
 0x109   :  { %v1133_v27 = vadd.f32 %v1132_v62, %v1131_v3  ;;  %v1468_v45 = vadd.f32 %v1309_v4, %v2736_v40  ;;  %v2800_v11 = vadd.f32 %v1315_v54, %v2764_v47  ;;  %v1470_v26 = vadd.f32 %v1321_v0, %v2766_v18  ;;  %v2338_v62 = vld [vmem:[%s3354_s1 + $0x60] sm:$0xff]  }
 0x10a   :  { %v2804_v50 = vadd.f32 %v1327_v1, %v2768_v19  ;;  %v1116_v17 = vrot.slane %v1115_v12, 1  ;;  %v1122_v2 = vrot.slane %v1121_v21, 1  ;;  %v1128_v24 = vrot.slane %v1127_v22, 1  ;;  %2284 = vmatprep.subr.bf16.mxu0 %v2338_v62  ;;  %2307 = vmatpush3.bf16.msra.mxu1 %v2341_v53 }
 0x10b   :  { %v1134_v25 = vrot.slane %v1133_v27, 1  ;;  %v3395_v6 = vrot.slane %v2738_v41, 1  ;;  %v3396_v40 = vrot.slane %v2742_v43, 1  ;;  %v1534_v18 = vpack.c.bf16 %v1468_v45, %v1468_v45  ;;  %2285 = vmatpush3.bf16.msra.mxu0 %v2340_v51  ;;  %v66_v45 = vpop.permute.xlu0 %65  ;;  %v2350_v51 = vld [vmem:[%s3354_s1 + $0x48] sm:$0xff]  }
 0x10c   :  { %3394 = vst [vmem:[#allocation24_spill] sm:$0xff] %v2804_v50  ;;  %v1536_v19 = vpack.c.bf16 %v1470_v26, %v1470_v26  ;;  %v1117_v58 = vadd.f32 %v1116_v17, %v1115_v12  ;;  %v1123_v34 = vadd.f32 %v1122_v2, %v1121_v21  ;;  %v1129_v59 = vadd.f32 %v1128_v24, %v1127_v22 }
 0x10d   :  { %v413_v39 = vadd.f32 %v3395_v6, %v2738_v41  ;;  %v425_v47 = vadd.f32 %v3396_v40, %v2742_v43  ;;  %v1135_v60 = vadd.f32 %v1134_v25, %v1133_v27  ;;  %v3397_v41 = vrot.slane %v2740_v42, 1  ;;  %v2346_v6 = vld [vmem:[%s3354_s1 + $0x50] sm:$0xff]  }
 0x10e   :  { %v3398_v43 = vrot.slane %v2744_v44, 1  ;;  %vm192_vm0 = vcmp.eq.s32.totalorder %v122_v15, %v2405_v28  ;;  %vm193_vm1 = vcmp.eq.s32.totalorder %v122_v15, %v2408_v29  ;;  %vm194_vm2 = vcmp.eq.s32.totalorder %v122_v15, %v2411_v30 }
 0x10f   :  { %v419_v48 = vadd.f32 %v3397_v41, %v2740_v42  ;;  %v2836_v4 = vadd.f32 %v1117_v58, %v413_v39  ;;  %v2838_v54 = vadd.f32 %v1129_v59, %v425_v47  ;;  %v2342_v42 = vld [vmem:[%s3354_s1 + $0x58] sm:$0xff]   ;;  %vm195_vm3 = vcmp.eq.s32.totalorder %v122_v15, %v2414_v31  ;;  %v2347_v39 = vld [vmem:[%s3354_s1 + $0xd0] sm:$0xff]  }
 0x110   :  { %v431_v20 = vadd.f32 %v3398_v43, %v2744_v44  ;;  %v2343_v44 = vld [vmem:[%s3354_s1 + $0xd8] sm:$0xff]   ;;  %v2166_v0 = vsel %vm192_vm0, 1.0, %v3389_v8  ;;  %v2167_v1 = vsel %vm193_vm1, 1.0, %v3389_v8  ;;  %v2856_v12 = vunpack.c.l.b16 %v1534_v18  ;;  %2286 = vmatprep.subr.bf16.mxu0 %v2342_v42  ;;  %v2348_v18 = vld [vmem:[%s3354_s1 + $0x10] sm:$0xff]   ;;  %v2352_v42 = vld [vmem:[%s3354_s1 + $0x8] sm:$0xff]  }
 0x111   :  { %v2858_v21 = vunpack.c.l.b16 %v1536_v19  ;;  %v2860_v22 = vadd.f32 %v1123_v34, %v419_v48  ;;  %v2168_v26 = vsel %vm194_vm2, 1.0, %v3389_v8  ;;  %v2169_v17 = vsel %vm195_vm3, 1.0, %v3389_v8  ;;  %2308 = vmatprep.subr.bf16.mxu1 %v2343_v44  ;;  %2287 = vmatpush3.bf16.msra.mxu0 %v2344_v9  ;;  %v2349_v19 = vld [vmem:[%s3354_s1 + $0x90] sm:$0xff]   ;;  %v2351_v34 = vld [vmem:[%s3354_s1 + $0xc8] sm:$0xff]  }
 0x112   :  { %3399 = vst [vmem:[#allocation25_spill] sm:$0xff] %v2856_v12  ;;  %v2862_v27 = vadd.f32 %v1135_v60, %v431_v20  ;;  %v624_v2 = vrot.slane %v2166_v0, 4  ;;  %v630_v24 = vrot.slane %v2167_v1, 4  ;;  %v1502_v25 = vpack.c.bf16 %v2836_v4, %v2836_v4  ;;  %2309 = vmatpush3.bf16.msra.mxu1 %v2345_v10  ;;  %2288 = vmatprep.subr.bf16.mxu0 %v2346_v6  ;;  %v2353_v10 = vld [vmem:[%s3354_s1 + $0x88] sm:$0xff]  }
 0x113   :  { %3400 = vst [vmem:[#allocation26_spill] sm:$0xff] %v2858_v21  ;;  %v1504_v15 = vpack.c.bf16 %v2838_v54, %v2838_v54  ;;  %v636_v62 = vrot.slane %v2168_v26, 4  ;;  %v642_v35 = vrot.slane %v2169_v17, 4  ;;  %vm160_vm4 = vcmp.eq.s32.totalorder %v66_v45, %v2405_v28  ;;  %2310 = vmatprep.subr.bf16.mxu1 %v2347_v39 }
 0x114   :  { %3401 = vst [vmem:[#allocation27_spill] sm:$0xff] %v2862_v27  ;;  %v625_v40 = vadd.f32 %v2166_v0, %v624_v2  ;;  %v631_v47 = vadd.f32 %v2167_v1, %v630_v24  ;;  %vm161_vm5 = vcmp.eq.s32.totalorder %v66_v45, %v2408_v29  ;;  %vm162_vm6 = vcmp.eq.s32.totalorder %v66_v45, %v2411_v30 }
 0x115   :  { %v637_v53 = vadd.f32 %v2168_v26, %v636_v62  ;;  %v643_v58 = vadd.f32 %v2169_v17, %v642_v35  ;;  %vm163_vm7 = vcmp.eq.s32.totalorder %v66_v45, %v2414_v31  ;;  %v2134_v41 = vsel %vm160_vm4, 1.0, %v3389_v8  ;;  %2289 = vmatpush3.bf16.msra.mxu0 %v2348_v18  ;;  %v2354_v45 = vld [vmem:[%s3354_s1 + $0x40] sm:$0xff]  }
 0x116   :  { %v626_v59 = vrot.slane %v625_v40, 2  ;;  %v632_v60 = vrot.slane %v631_v47, 2  ;;  %v2135_v48 = vsel %vm161_vm5, 1.0, %v3389_v8  ;;  %v2136_v4 = vsel %vm162_vm6, 1.0, %v3389_v8  ;;  %2311 = vmatpush3.bf16.msra.mxu1 %v2349_v19  ;;  %2290 = vmatprep.subr.bf16.mxu0 %v2350_v51  ;;  %v2355_v62 = vld [vmem:[%s3354_s1 + $0xc0] sm:$0xff]  }
 0x117   :  { %v638_v43 = vrot.slane %v637_v53, 2  ;;  %v644_v20 = vrot.slane %v643_v58, 2  ;;  %v2137_v54 = vsel %vm163_vm7, 1.0, %v3389_v8  ;;  %v432_v1 = vrot.slane %v2134_v41, 4  ;;  %2312 = vmatprep.subr.bf16.mxu1 %v2351_v34 }
 0x118   :  { %v627_v44 = vadd.f32 %v626_v59, %v625_v40  ;;  %v633_v0 = vadd.f32 %v632_v60, %v631_v47  ;;  %v438_v9 = vrot.slane %v2135_v48, 4  ;;  %v444_v2 = vrot.slane %v2136_v4, 4 }
 0x119   :  { %v639_v26 = vadd.f32 %v638_v43, %v637_v53  ;;  %v645_v17 = vadd.f32 %v644_v20, %v643_v58  ;;  %v450_v24 = vrot.slane %v2137_v54, 4  ;;  %v433_v39 = vadd.f32 %v2134_v41, %v432_v1  ;;  %v835_v53 = vpop.permute.xlu1 %834  ;;  %2291 = vmatpush3.bf16.msra.mxu0 %v2352_v42  ;;  %v2356_v58 = vld [vmem:[%s3354_s1] sm:$0xff]  }
 0x11a   :  { %v439_v40 = vadd.f32 %v2135_v48, %v438_v9  ;;  %v2912_v47 = vunpack.c.l.b16 %v1502_v25  ;;  %v2914_v18 = vunpack.c.l.b16 %v1504_v15  ;;  %v445_v19 = vadd.f32 %v2136_v4, %v444_v2  ;;  %2313 = vmatpush3.bf16.msra.mxu1 %v2353_v10  ;;  %2292 = vmatprep.subr.bf16.mxu0 %v2354_v45  ;;  %v2357_v25 = vld [vmem:[%s3354_s1 + $0x80] sm:$0xff]   ;;  %s2381_s1 = smov [#allocation3]  }
 0x11b   :  { %v451_v51 = vadd.f32 %v2137_v54, %v450_v24  ;;  %v628_v34 = vrot.slane %v627_v44, 1  ;;  %v634_v59 = vrot.slane %v633_v0, 1  ;;  %v434_v60 = vrot.slane %v433_v39, 2  ;;  %2314 = vmatprep.subr.bf16.mxu1 %v2355_v62  ;;  %s2107_s18 = sshll.u32 %s2381_s1, 4  ;;  %s2108_s18 = int_to_ptr.vmem [resolvable:$true] %s2107_s18 }
 0x11c   :  { %3402 = vst [vmem:[#allocation28_spill] sm:$0xff] %v2912_v47  ;;  %3403 = vst [vmem:[#allocation29_spill] sm:$0xff] %v2914_v18  ;;  %v440_v43 = vrot.slane %v439_v40, 2  ;;  %v640_v15 = vrot.slane %v639_v26, 1  ;;  %v646_v41 = vrot.slane %v645_v17, 1  ;;  %v446_v48 = vrot.slane %v445_v19, 2  ;;  %p2363_p1 = scmp.lt.s32.totalorder %s2108_s18, %s2108_s18 }
 0x11d   :  { %v452_v20 = vrot.slane %v451_v51, 2  ;;  %v435_v4 = vadd.f32 %v434_v60, %v433_v39  ;;  %vm896_vm8 = vcmp.eq.s32.totalorder %v835_v53, %v2405_v28  ;;  %vm897_vm9 = vcmp.eq.s32.totalorder %v835_v53, %v2408_v29  ;;  %2293 = vmatpush3.bf16.msra.mxu0 %v2356_v58  ;;  %s2358_s19 = scalar_lea.vmem %s2108_s18, 256 }
 0x11e   :  { %v441_v54 = vadd.f32 %v440_v43, %v439_v40  ;;  %v447_v42 = vadd.f32 %v446_v48, %v445_v19  ;;  %vm898_vm10 = vcmp.eq.s32.totalorder %v835_v53, %v2411_v30  ;;  %vm899_vm11 = vcmp.eq.s32.totalorder %v835_v53, %v2414_v31  ;;  %2315 = vmatpush3.bf16.msra.mxu1 %v2357_v25  ;;  %v803_v19 = vpop.permute.xlu0 %802  ;;  %p2359_p0 = scmp.ne.s32.totalorder %s2108_s18, %s2358_s19  ;;  %p2364_p2 = scmp.lt.s32.totalorder %s2358_s19, %s2358_s19 }
 0x11f   :  { %v2924_v1 = vadd.f32 %v452_v20, %v451_v51  ;;  %v629_v9 = vadd.f32 %v628_v34, %v627_v44  ;;  %v2928_v10 = vadd.f32 %v634_v59, %v633_v0  ;;  %v2230_v45 = vsel %vm896_vm8, 1.0, %v3389_v8 }
 0x120   :  { %v2231_v2 = vsel %vm897_vm9, 1.0, %v3389_v8  ;;  %v641_v24 = vadd.f32 %v640_v15, %v639_v26  ;;  %v2932_v62 = vadd.f32 %v646_v41, %v645_v17  ;;  %v2232_v39 = vsel %vm898_vm10, 1.0, %v3389_v8  ;;  %p2365_p3 = por %p2364_p2, %p2363_p1 }
 0x121   :  { %v2233_v40 = vsel %vm899_vm11, 1.0, %v3389_v8  ;;  %v436_v51 = vrot.slane %v435_v4, 1  ;;  %v442_v60 = vrot.slane %v441_v54, 1  ;;  %v1328_v53 = vrot.slane %v2230_v45, 4 }
 0x122   :  { %3404 = vst [vmem:[#allocation30_spill] sm:$0xff] %v2932_v62  ;;  %v1334_v58 = vrot.slane %v2231_v2, 4  ;;  %v448_v44 = vrot.slane %v447_v42, 1  ;;  %v454_v0 = vrot.slane %v2924_v1, 1  ;;  %v1340_v34 = vrot.slane %v2232_v39, 4  ;;  %p2366_p4 = pnand %p2365_p3, %p2359_p0 }
 0x123   :  { %v1346_v59 = vrot.slane %v2233_v40, 4  ;;  %v1329_v43 = vadd.f32 %v2230_v45, %v1328_v53  ;;  %vm864_vm12 = vcmp.eq.s32.totalorder %v803_v19, %v2405_v28  ;;  %vm865_vm13 = vcmp.eq.s32.totalorder %v803_v19, %v2408_v29 }
 0x124   :  { %v1335_v48 = vadd.f32 %v2231_v2, %v1334_v58  ;;  %v1341_v26 = vadd.f32 %v2232_v39, %v1340_v34  ;;  %vm866_vm14 = vcmp.eq.s32.totalorder %v803_v19, %v2411_v30  ;;  %vm867_vm15 = vcmp.eq.s32.totalorder %v803_v19, %v2414_v31 }
 0x125   :  { %v1347_v17 = vadd.f32 %v2233_v40, %v1346_v59  ;;  %v1330_v25 = vrot.slane %v1329_v43, 2  ;;  %v2198_v41 = vsel %vm864_vm12, 1.0, %v3389_v8  ;;  %v2199_v20 = vsel %vm865_vm13, 1.0, %v3389_v8 }
 0x126   :  { %v1336_v15 = vrot.slane %v1335_v48, 2  ;;  %v1342_v61 = vrot.slane %v1341_v26, 2  ;;  %v2200_v45 = vsel %vm866_vm14, 1.0, %v3389_v8  ;;  %v2201_v2 = vsel %vm867_vm15, 1.0, %v3389_v8 }
 0x127   :  { %v1348_v6 = vrot.slane %v1347_v17, 2  ;;  %v437_v53 = vadd.f32 %v436_v51, %v435_v4  ;;  %v1331_v58 = vadd.f32 %v1330_v25, %v1329_v43  ;;  %v1136_v39 = vrot.slane %v2198_v41, 4  ;;  %v129_v51 = vpop.permute.xlu1 %128 }
 0x128   :  { %v1142_v40 = vrot.slane %v2199_v20, 4  ;;  %v1337_v34 = vadd.f32 %v1336_v15, %v1335_v48  ;;  %v1343_v59 = vadd.f32 %v1342_v61, %v1341_v26  ;;  %v1148_v3 = vrot.slane %v2200_v45, 4 }
 0x129   :  { %v1154_v19 = vrot.slane %v2201_v2, 4  ;;  %v1332_v35 = vrot.slane %v1331_v58, 1  ;;  %v1349_v21 = vadd.f32 %v1348_v6, %v1347_v17  ;;  %v1137_v18 = vadd.f32 %v2198_v41, %v1136_v39 }
 0x12a   :  { %v1143_v12 = vadd.f32 %v2199_v20, %v1142_v40  ;;  %v2945_v13 = vadd.f32 %v442_v60, %v441_v54  ;;  %v1344_v47 = vrot.slane %v1343_v59, 1  ;;  %v1149_v7 = vadd.f32 %v2200_v45, %v1148_v3 }
 0x12b   :  { %v1155_v5 = vadd.f32 %v2201_v2, %v1154_v19  ;;  %v449_v37 = vadd.f32 %v448_v44, %v447_v42  ;;  %v1333_v56 = vadd.f32 %v1332_v35, %v1331_v58  ;;  %v1138_v32 = vrot.slane %v1137_v18, 2 }
 0x12c   :  { %v1144_v4 = vrot.slane %v1143_v12, 2  ;;  %v1338_v43 = vrot.slane %v1337_v34, 1  ;;  %v1345_v25 = vadd.f32 %v1344_v47, %v1343_v59  ;;  %v1150_v48 = vrot.slane %v1149_v7, 2 }
 0x12d   :  { %v1156_v61 = vrot.slane %v1155_v5, 2  ;;  %v1350_v26 = vrot.slane %v1349_v21, 1  ;;  %v1472_v15 = vadd.f32 %v1333_v56, %v629_v9  ;;  %v1139_v23 = vadd.f32 %v1138_v32, %v1137_v18 }
 0x12e   :  { %v1145_v6 = vadd.f32 %v1144_v4, %v1143_v12  ;;  %v2947_v17 = vadd.f32 %v1345_v25, %v641_v24  ;;  %v1151_v54 = vadd.f32 %v1150_v48, %v1149_v7  ;;  %vm196_vm0 = vcmp.eq.s32.totalorder %v129_v51, %v2405_v28  ;;  %v73_v24 = vpop.permute.xlu0 %72 }
 0x12f   :  { %v1157_v60 = vadd.f32 %v1156_v61, %v1155_v5  ;;  %v2951_v3 = vadd.f32 %v454_v0, %v2924_v1  ;;  %v1538_v35 = vpack.c.bf16 %v1472_v15, %v1472_v15  ;;  %v1140_v42 = vrot.slane %v1139_v23, 1 }
 0x130   :  { %3405 = vst [vmem:[#allocation31_spill] sm:$0xff] %v2947_v17  ;;  %vm197_vm1 = vcmp.eq.s32.totalorder %v129_v51, %v2408_v29  ;;  %v2954_v47 = vadd.f32 %v1338_v43, %v1337_v34  ;;  %v1152_v44 = vrot.slane %v1151_v54, 1  ;;  %vm198_vm2 = vcmp.eq.s32.totalorder %v129_v51, %v2411_v30 }
 0x131   :  { %vm199_vm3 = vcmp.eq.s32.totalorder %v129_v51, %v2414_v31  ;;  %v1141_v56 = vadd.f32 %v1140_v42, %v1139_v23  ;;  %v1146_v32 = vrot.slane %v1145_v6, 1  ;;  %v1158_v7 = vrot.slane %v1157_v60, 1 }
 0x132   :  { %v2170_v5 = vsel %vm196_vm0, 1.0, %v3389_v8  ;;  %v2959_v12 = vadd.f32 %v1350_v26, %v1349_v21  ;;  %v2963_v1 = vunpack.c.l.b16 %v1538_v35  ;;  %v2171_v9 = vsel %vm197_vm1, 1.0, %v3389_v8 }
 0x133   :  { %v1153_v0 = vadd.f32 %v1152_v44, %v1151_v54  ;;  %v2172_v41 = vsel %vm198_vm2, 1.0, %v3389_v8  ;;  %v2173_v20 = vsel %vm199_vm3, 1.0, %v3389_v8  ;;  %v648_v23 = vrot.slane %v2170_v5, 4 }
 0x134   :  { %3406 = vst [vmem:[#allocation32_spill] sm:$0xff] %v2959_v12  ;;  %3407 = vst [vmem:[#allocation33_spill] sm:$0xff] %v2963_v1  ;;  %v1440_v45 = vadd.f32 %v1141_v56, %v437_v53  ;;  %v654_v2 = vrot.slane %v2171_v9, 4  ;;  %v660_v58 = vrot.slane %v2172_v41, 4  ;;  %v666_v39 = vrot.slane %v2173_v20, 4 }
 0x135   :  { %v2968_v21 = vadd.f32 %v1146_v32, %v1145_v6  ;;  %v2970_v40 = vadd.f32 %v1158_v7, %v1157_v60  ;;  %v649_v34 = vadd.f32 %v2170_v5, %v648_v23  ;;  %vm164_vm4 = vcmp.eq.s32.totalorder %v73_v24, %v2405_v28 }
 0x136   :  { %v655_v59 = vadd.f32 %v2171_v9, %v654_v2  ;;  %v661_v19 = vadd.f32 %v2172_v41, %v660_v58  ;;  %v667_v4 = vadd.f32 %v2173_v20, %v666_v39  ;;  %vm165_vm5 = vcmp.eq.s32.totalorder %v73_v24, %v2408_v29  ;;  %v839_v41 = vpop.permute.xlu1 %838 }
 0x137   :  { %v2974_v51 = vadd.f32 %v1153_v0, %v449_v37  ;;  %v650_v43 = vrot.slane %v649_v34, 2  ;;  %vm166_vm6 = vcmp.eq.s32.totalorder %v73_v24, %v2411_v30  ;;  %vm167_vm7 = vcmp.eq.s32.totalorder %v73_v24, %v2414_v31 }
 0x138   :  { %v1506_v53 = vpack.c.bf16 %v1440_v45, %v1440_v45  ;;  %v656_v25 = vrot.slane %v655_v59, 2  ;;  %v662_v48 = vrot.slane %v661_v19, 2  ;;  %v668_v61 = vrot.slane %v667_v4, 2 }
 0x139   :  { %3408 = vst [vmem:[#allocation34_spill] sm:$0xff] %v2974_v51  ;;  %v651_v26 = vadd.f32 %v650_v43, %v649_v34  ;;  %v2138_v15 = vsel %vm164_vm4, 1.0, %v3389_v8  ;;  %v2139_v6 = vsel %vm165_vm5, 1.0, %v3389_v8  ;;  %v2140_v54 = vsel %vm166_vm6, 1.0, %v3389_v8 }
 0x13a   :  { %v657_v60 = vadd.f32 %v656_v25, %v655_v59  ;;  %v663_v35 = vadd.f32 %v662_v48, %v661_v19  ;;  %v669_v37 = vadd.f32 %v668_v61, %v667_v4  ;;  %v2141_v42 = vsel %vm167_vm7, 1.0, %v3389_v8  ;;  %v136_v46 = vpop.permute.xlu1 %135 }
 0x13b   :  { %v652_v44 = vrot.slane %v651_v26, 1  ;;  %v456_v56 = vrot.slane %v2138_v15, 4  ;;  %v462_v32 = vrot.slane %v2139_v6, 4  ;;  %v468_v7 = vrot.slane %v2140_v54, 4 }
 0x13c   :  { %v2984_v9 = vunpack.c.l.b16 %v1506_v53  ;;  %v658_v24 = vrot.slane %v657_v60, 1  ;;  %v474_v0 = vrot.slane %v2141_v42, 4  ;;  %v664_v20 = vrot.slane %v663_v35, 1 }
 0x13d   :  { %v457_v23 = vadd.f32 %v2138_v15, %v456_v56  ;;  %v463_v45 = vadd.f32 %v2139_v6, %v462_v32  ;;  %v469_v2 = vadd.f32 %v2140_v54, %v468_v7  ;;  %v2986_v58 = vadd.f32 %v652_v44, %v651_v26 }
 0x13e   :  { %3409 = vst [vmem:[#allocation35_spill] sm:$0xff] %v2984_v9  ;;  %v2988_v39 = vadd.f32 %v658_v24, %v657_v60  ;;  %v670_v34 = vrot.slane %v669_v37, 1  ;;  %v475_v59 = vadd.f32 %v2141_v42, %v474_v0  ;;  %vm900_vm8 = vcmp.eq.s32.totalorder %v839_v41, %v2405_v28 }
 0x13f   :  { %v458_v19 = vrot.slane %v457_v23, 2  ;;  %v464_v4 = vrot.slane %v463_v45, 2  ;;  %v470_v43 = vrot.slane %v469_v2, 2  ;;  %vm901_vm9 = vcmp.eq.s32.totalorder %v839_v41, %v2408_v29 }
 0x140   :  { %v476_v53 = vrot.slane %v475_v59, 2  ;;  %vm902_vm10 = vcmp.eq.s32.totalorder %v839_v41, %v2411_v30  ;;  %vm903_vm11 = vcmp.eq.s32.totalorder %v839_v41, %v2414_v31  ;;  %v2234_v26 = vsel %vm900_vm8, 1.0, %v3389_v8 }
 0x141   :  { %v459_v25 = vadd.f32 %v458_v19, %v457_v23  ;;  %v465_v48 = vadd.f32 %v464_v4, %v463_v45  ;;  %v471_v61 = vadd.f32 %v470_v43, %v469_v2  ;;  %v2235_v6 = vsel %vm901_vm9, 1.0, %v3389_v8  ;;  %v807_v23 = vpop.permute.xlu0 %806 }
 0x142   :  { %v477_v15 = vadd.f32 %v476_v53, %v475_v59  ;;  %v2236_v54 = vsel %vm902_vm10, 1.0, %v3389_v8  ;;  %v2237_v60 = vsel %vm903_vm11, 1.0, %v3389_v8  ;;  %v665_v42 = vadd.f32 %v664_v20, %v663_v35 }
 0x143   :  { %v460_v44 = vrot.slane %v459_v25, 1  ;;  %v466_v56 = vrot.slane %v465_v48, 1  ;;  %v1352_v32 = vrot.slane %v2234_v26, 4  ;;  %v2998_v7 = vadd.f32 %v670_v34, %v669_v37 }
 0x144   :  { %v1358_v24 = vrot.slane %v2235_v6, 4  ;;  %v1364_v0 = vrot.slane %v2236_v54, 4  ;;  %v1370_v41 = vrot.slane %v2237_v60, 4  ;;  %v472_v2 = vrot.slane %v471_v61, 1 }
 0x145   :  { %3410 = vst [vmem:[#allocation36_spill] sm:$0xff] %v2998_v7  ;;  %v3000_v45 = vadd.f32 %v460_v44, %v459_v25  ;;  %v478_v59 = vrot.slane %v477_v15, 1  ;;  %v1353_v19 = vadd.f32 %v2234_v26, %v1352_v32  ;;  %v3002_v4 = vadd.f32 %v466_v56, %v465_v48 }
 0x146   :  { %v1359_v43 = vadd.f32 %v2235_v6, %v1358_v24  ;;  %v1365_v53 = vadd.f32 %v2236_v54, %v1364_v0  ;;  %v1371_v5 = vadd.f32 %v2237_v60, %v1370_v41  ;;  %vm868_vm12 = vcmp.eq.s32.totalorder %v807_v23, %v2405_v28 }
 0x147   :  { %v1354_v35 = vrot.slane %v1353_v19, 2  ;;  %vm869_vm13 = vcmp.eq.s32.totalorder %v807_v23, %v2408_v29  ;;  %vm870_vm14 = vcmp.eq.s32.totalorder %v807_v23, %v2411_v30  ;;  %vm871_vm15 = vcmp.eq.s32.totalorder %v807_v23, %v2414_v31 }
 0x148   :  { %v1360_v37 = vrot.slane %v1359_v43, 2  ;;  %v1366_v20 = vrot.slane %v1365_v53, 2  ;;  %v1372_v34 = vrot.slane %v1371_v5, 2  ;;  %v2202_v26 = vsel %vm868_vm12, 1.0, %v3389_v8 }
 0x149   :  { %v1355_v25 = vadd.f32 %v1354_v35, %v1353_v19  ;;  %v2203_v48 = vsel %vm869_vm13, 1.0, %v3389_v8  ;;  %v2204_v6 = vsel %vm870_vm14, 1.0, %v3389_v8  ;;  %v2205_v56 = vsel %vm871_vm15, 1.0, %v3389_v8 }
 0x14a   :  { %v1361_v54 = vadd.f32 %v1360_v37, %v1359_v43  ;;  %v1367_v60 = vadd.f32 %v1366_v20, %v1365_v53  ;;  %v1373_v44 = vadd.f32 %v1372_v34, %v1371_v5  ;;  %v1160_v24 = vrot.slane %v2202_v26, 4 }
 0x14b   :  { %v1356_v32 = vrot.slane %v1355_v25, 1  ;;  %v1166_v0 = vrot.slane %v2203_v48, 4  ;;  %v1172_v41 = vrot.slane %v2204_v6, 4  ;;  %v1178_v23 = vrot.slane %v2205_v56, 4 }
 0x14c   :  { %v1362_v18 = vrot.slane %v1361_v54, 1  ;;  %v1368_v51 = vrot.slane %v1367_v60, 1  ;;  %v1374_v1 = vrot.slane %v1373_v44, 1  ;;  %v1161_v35 = vadd.f32 %v2202_v26, %v1160_v24 }
 0x14d   :  { %v1357_v19 = vadd.f32 %v1356_v32, %v1355_v25  ;;  %v1167_v17 = vadd.f32 %v2203_v48, %v1166_v0  ;;  %v1173_v9 = vadd.f32 %v2204_v6, %v1172_v41  ;;  %v473_v55 = vadd.f32 %v472_v2, %v471_v61 }
 0x14e   :  { %v3012_v52 = vadd.f32 %v478_v59, %v477_v15  ;;  %v1369_v43 = vadd.f32 %v1368_v51, %v1367_v60  ;;  %v1179_v5 = vadd.f32 %v2205_v56, %v1178_v23  ;;  %v3014_v53 = vadd.f32 %v1362_v18, %v1361_v54  ;;  %v80_v54 = vpop.permute.xlu0 %79 }
 0x14f   :  { %v1162_v37 = vrot.slane %v1161_v35, 2  ;;  %v1168_v20 = vrot.slane %v1167_v17, 2  ;;  %v1174_v34 = vrot.slane %v1173_v9, 2  ;;  %v3016_v63 = vadd.f32 %v1374_v1, %v1373_v44 }
 0x150   :  { %v3019_v36 = vadd.f32 %v1357_v19, %v2986_v58  ;;  %v1180_v25 = vrot.slane %v1179_v5, 2  ;;  %vm200_vm0 = vcmp.eq.s32.totalorder %v136_v46, %v2405_v28  ;;  %vm201_vm1 = vcmp.eq.s32.totalorder %v136_v46, %v2408_v29 }
 0x151   :  { %3411 = vst [vmem:[#allocation37_spill] sm:$0xff] %v3016_v63  ;;  %v1163_v26 = vadd.f32 %v1162_v37, %v1161_v35  ;;  %v1169_v48 = vadd.f32 %v1168_v20, %v1167_v17  ;;  %v1175_v61 = vadd.f32 %v1174_v34, %v1173_v9  ;;  %v3023_v51 = vadd.f32 %v1369_v43, %v665_v42 }
 0x152   :  { %3412 = vst [vmem:[#allocation38_spill] sm:$0xff] %v3019_v36  ;;  %v1181_v18 = vadd.f32 %v1180_v25, %v1179_v5  ;;  %vm202_vm2 = vcmp.eq.s32.totalorder %v136_v46, %v2411_v30  ;;  %vm203_vm3 = vcmp.eq.s32.totalorder %v136_v46, %v2414_v31  ;;  %v2174_v58 = vsel %vm200_vm0, 1.0, %v3389_v8 }
 0x153   :  { %3413 = vst [vmem:[#allocation39_spill] sm:$0xff] %v3023_v51  ;;  %v1164_v1 = vrot.slane %v1163_v26, 1  ;;  %v1170_v15 = vrot.slane %v1169_v48, 1  ;;  %v1176_v2 = vrot.slane %v1175_v61, 1  ;;  %v2175_v6 = vsel %vm201_vm1, 1.0, %v3389_v8 }
 0x154   :  { %v1182_v59 = vrot.slane %v1181_v18, 1  ;;  %v2176_v17 = vsel %vm202_vm2, 1.0, %v3389_v8  ;;  %v2177_v9 = vsel %vm203_vm3, 1.0, %v3389_v8  ;;  %v672_v56 = vrot.slane %v2174_v58, 4 }
 0x155   :  { %v1165_v60 = vadd.f32 %v1164_v1, %v1163_v26  ;;  %v1177_v44 = vadd.f32 %v1176_v2, %v1175_v61  ;;  %v3033_v46 = vadd.f32 %v1170_v15, %v1169_v48  ;;  %v678_v32 = vrot.slane %v2175_v6, 4 }
 0x156   :  { %v684_v24 = vrot.slane %v2176_v17, 4  ;;  %v690_v0 = vrot.slane %v2177_v9, 4  ;;  %v3035_v41 = vadd.f32 %v1182_v59, %v1181_v18  ;;  %v673_v19 = vadd.f32 %v2174_v58, %v672_v56 }
 0x157   :  { %v3038_v23 = vadd.f32 %v1165_v60, %v3000_v45  ;;  %vm168_vm4 = vcmp.eq.s32.totalorder %v80_v54, %v2405_v28  ;;  %v679_v35 = vadd.f32 %v2175_v6, %v678_v32  ;;  %vm169_vm5 = vcmp.eq.s32.totalorder %v80_v54, %v2408_v29  ;;  %v843_v60 = vpop.permute.xlu1 %842 }
 0x158   :  { %v685_v43 = vadd.f32 %v2176_v17, %v684_v24  ;;  %v691_v5 = vadd.f32 %v2177_v9, %v690_v0  ;;  %v3042_v37 = vadd.f32 %v1177_v44, %v473_v55  ;;  %v674_v34 = vrot.slane %v673_v19, 2 }
 0x159   :  { %3414 = vst [vmem:[#allocation40_spill] sm:$0xff] %v3038_v23  ;;  %vm170_vm6 = vcmp.eq.s32.totalorder %v80_v54, %v2411_v30  ;;  %v680_v25 = vrot.slane %v679_v35, 2  ;;  %vm171_vm7 = vcmp.eq.s32.totalorder %v80_v54, %v2414_v31  ;;  %v2142_v61 = vsel %vm168_vm4, 1.0, %v3389_v8 }
 0x15a   :  { %3415 = vst [vmem:[#allocation41_spill] sm:$0xff] %v3042_v37  ;;  %v686_v26 = vrot.slane %v685_v43, 2  ;;  %v692_v45 = vrot.slane %v691_v5, 2  ;;  %v675_v48 = vadd.f32 %v674_v34, %v673_v19  ;;  %v2143_v18 = vsel %vm169_vm5, 1.0, %v3389_v8 }
 0x15b   :  { %v2144_v1 = vsel %vm170_vm6, 1.0, %v3389_v8  ;;  %v3051_v55 = vadd.f32 %v680_v25, %v679_v35  ;;  %v2145_v58 = vsel %vm171_vm7, 1.0, %v3389_v8  ;;  %v480_v6 = vrot.slane %v2142_v61, 4 }
 0x15c   :  { %v687_v15 = vadd.f32 %v686_v26, %v685_v43  ;;  %v3053_v2 = vadd.f32 %v692_v45, %v691_v5  ;;  %v676_v59 = vrot.slane %v675_v48, 1  ;;  %v486_v17 = vrot.slane %v2143_v18, 4 }
 0x15d   :  { %v492_v9 = vrot.slane %v2144_v1, 4  ;;  %v498_v32 = vrot.slane %v2145_v58, 4  ;;  %v481_v0 = vadd.f32 %v2142_v61, %v480_v6  ;;  %vm904_vm8 = vcmp.eq.s32.totalorder %v843_v60, %v2405_v28 }
 0x15e   :  { %v688_v56 = vrot.slane %v687_v15, 1  ;;  %v487_v19 = vadd.f32 %v2143_v18, %v486_v17  ;;  %v3060_v43 = vadd.f32 %v676_v59, %v675_v48  ;;  %vm905_vm9 = vcmp.eq.s32.totalorder %v843_v60, %v2408_v29 }
 0x15f   :  { %v493_v35 = vadd.f32 %v2144_v1, %v492_v9  ;;  %v499_v5 = vadd.f32 %v2145_v58, %v498_v32  ;;  %v482_v34 = vrot.slane %v481_v0, 2  ;;  %vm906_vm10 = vcmp.eq.s32.totalorder %v843_v60, %v2411_v30  ;;  %v811_v32 = vpop.permute.xlu0 %810 }
 0x160   :  { %3416 = vst [vmem:[#allocation42_spill] sm:$0xff] %v3060_v43  ;;  %v488_v25 = vrot.slane %v487_v19, 2  ;;  %vm907_vm11 = vcmp.eq.s32.totalorder %v843_v60, %v2414_v31  ;;  %v2238_v54 = vsel %vm904_vm8, 1.0, %v3389_v8  ;;  %v2239_v61 = vsel %vm905_vm9, 1.0, %v3389_v8 }
 0x161   :  { %v494_v26 = vrot.slane %v493_v35, 2  ;;  %v500_v45 = vrot.slane %v499_v5, 2  ;;  %v483_v18 = vadd.f32 %v482_v34, %v481_v0  ;;  %v2240_v58 = vsel %vm906_vm10, 1.0, %v3389_v8 }
 0x162   :  { %v3068_v48 = vadd.f32 %v488_v25, %v487_v19  ;;  %v2241_v6 = vsel %vm907_vm11, 1.0, %v3389_v8  ;;  %v1376_v17 = vrot.slane %v2238_v54, 4  ;;  %v1382_v9 = vrot.slane %v2239_v61, 4 }
 0x163   :  { %v495_v1 = vadd.f32 %v494_v26, %v493_v35  ;;  %v3071_v59 = vadd.f32 %v500_v45, %v499_v5  ;;  %v3074_v42 = vadd.f32 %v688_v56, %v687_v15  ;;  %v484_v60 = vrot.slane %v483_v18, 1 }
 0x164   :  { %v1388_v24 = vrot.slane %v2240_v58, 4  ;;  %v1377_v0 = vadd.f32 %v2238_v54, %v1376_v17  ;;  %v1383_v19 = vadd.f32 %v2239_v61, %v1382_v9  ;;  %v1394_v34 = vrot.slane %v2241_v6, 4 }
 0x165   :  { %3417 = vst [vmem:[#allocation43_spill] sm:$0xff] %v3074_v42  ;;  %v496_v44 = vrot.slane %v495_v1, 1  ;;  %v3077_v35 = vadd.f32 %v484_v60, %v483_v18  ;;  %vm872_vm12 = vcmp.eq.s32.totalorder %v811_v32, %v2405_v28  ;;  %vm873_vm13 = vcmp.eq.s32.totalorder %v811_v32, %v2408_v29  ;;  %v143_v60 = vpop.permute.xlu1 %142  ;;  %v87_v42 = vpop.permute.xlu0 %86 }
 0x166   :  { %v1389_v25 = vadd.f32 %v2240_v58, %v1388_v24  ;;  %v1378_v26 = vrot.slane %v1377_v0, 2  ;;  %v1384_v45 = vrot.slane %v1383_v19, 2  ;;  %v1395_v37 = vadd.f32 %v2241_v6, %v1394_v34 }
 0x167   :  { %3418 = vst [vmem:[#allocation44_spill] sm:$0xff] %v3077_v35  ;;  %vm874_vm14 = vcmp.eq.s32.totalorder %v811_v32, %v2411_v30  ;;  %vm875_vm15 = vcmp.eq.s32.totalorder %v811_v32, %v2414_v31  ;;  %v2206_v54 = vsel %vm872_vm12, 1.0, %v3389_v8  ;;  %v2207_v24 = vsel %vm873_vm13, 1.0, %v3389_v8 }
 0x168   :  { %v1390_v15 = vrot.slane %v1389_v25, 2  ;;  %v1379_v56 = vadd.f32 %v1378_v26, %v1377_v0  ;;  %v3085_v61 = vadd.f32 %v1384_v45, %v1383_v19  ;;  %v1396_v18 = vrot.slane %v1395_v37, 2 }
 0x169   :  { %v2208_v17 = vsel %vm874_vm14, 1.0, %v3389_v8  ;;  %v2209_v6 = vsel %vm875_vm15, 1.0, %v3389_v8  ;;  %v1184_v9 = vrot.slane %v2206_v54, 4  ;;  %v3090_v34 = vadd.f32 %v496_v44, %v495_v1 }
 0x16a   :  { %v1391_v58 = vadd.f32 %v1390_v15, %v1389_v25  ;;  %v1380_v5 = vrot.slane %v1379_v56, 1  ;;  %v3092_v20 = vadd.f32 %v1396_v18, %v1395_v37  ;;  %v1190_v32 = vrot.slane %v2207_v24, 4 }
 0x16b   :  { %3419 = vst [vmem:[#allocation45_spill] sm:$0xff] %v3090_v34  ;;  %v1185_v19 = vadd.f32 %v2206_v54, %v1184_v9  ;;  %v1196_v26 = vrot.slane %v2208_v17, 4  ;;  %v1202_v45 = vrot.slane %v2209_v6, 4  ;;  %vm204_vm0 = vcmp.eq.s32.totalorder %v143_v60, %v2405_v28 }
 0x16c   :  { %v3095_v51 = vadd.f32 %v1380_v5, %v1379_v56  ;;  %v1392_v25 = vrot.slane %v1391_v58, 1  ;;  %v1191_v15 = vadd.f32 %v2207_v24, %v1190_v32  ;;  %vm205_vm1 = vcmp.eq.s32.totalorder %v143_v60, %v2408_v29 }
 0x16d   :  { %v1186_v36 = vrot.slane %v1185_v19, 2  ;;  %v1197_v44 = vadd.f32 %v2208_v17, %v1196_v26  ;;  %v1203_v1 = vadd.f32 %v2209_v6, %v1202_v45  ;;  %vm206_vm2 = vcmp.eq.s32.totalorder %v143_v60, %v2411_v30 }
 0x16e   :  { %3420 = vst [vmem:[#allocation46_spill] sm:$0xff] %v3095_v51  ;;  %v1192_v34 = vrot.slane %v1191_v15, 2  ;;  %vm207_vm3 = vcmp.eq.s32.totalorder %v143_v60, %v2414_v31  ;;  %v2178_v56 = vsel %vm204_vm0, 1.0, %v3389_v8  ;;  %v2179_v24 = vsel %vm205_vm1, 1.0, %v3389_v8 }
 0x16f   :  { %v1187_v37 = vadd.f32 %v1186_v36, %v1185_v19  ;;  %v1198_v54 = vrot.slane %v1197_v44, 2  ;;  %v1204_v5 = vrot.slane %v1203_v1, 2  ;;  %v2180_v9 = vsel %vm206_vm2, 1.0, %v3389_v8 }
 0x170   :  { %v3103_v18 = vadd.f32 %v1192_v34, %v1191_v15  ;;  %v2181_v17 = vsel %vm207_vm3, 1.0, %v3389_v8  ;;  %v696_v45 = vrot.slane %v2178_v56, 4  ;;  %v3110_v60 = vadd.f32 %v1392_v25, %v1391_v58 }
 0x171   :  { %v1188_v6 = vrot.slane %v1187_v37, 1  ;;  %v1199_v32 = vadd.f32 %v1198_v54, %v1197_v44  ;;  %v3108_v26 = vadd.f32 %v1204_v5, %v1203_v1  ;;  %v702_v36 = vrot.slane %v2179_v24, 4 }
 0x172   :  { %3421 = vst [vmem:[#allocation47_spill] sm:$0xff] %v3110_v60  ;;  %v708_v19 = vrot.slane %v2180_v9, 4  ;;  %v714_v0 = vrot.slane %v2181_v17, 4  ;;  %v697_v51 = vadd.f32 %v2178_v56, %v696_v45  ;;  %vm172_vm4 = vcmp.eq.s32.totalorder %v87_v42, %v2405_v28 }
 0x173   :  { %v3112_v23 = vadd.f32 %v1188_v6, %v1187_v37  ;;  %v1200_v15 = vrot.slane %v1199_v32, 1  ;;  %v703_v43 = vadd.f32 %v2179_v24, %v702_v36  ;;  %vm173_vm5 = vcmp.eq.s32.totalorder %v87_v42, %v2408_v29  ;;  %v847_v24 = vpop.permute.xlu1 %846 }
 0x174   :  { %v709_v35 = vadd.f32 %v2180_v9, %v708_v19  ;;  %v715_v50 = vadd.f32 %v2181_v17, %v714_v0  ;;  %v698_v1 = vrot.slane %v697_v51, 2  ;;  %vm174_vm6 = vcmp.eq.s32.totalorder %v87_v42, %v2411_v30 }
 0x175   :  { %3422 = vst [vmem:[#allocation48_spill] sm:$0xff] %v3112_v23  ;;  %v704_v58 = vrot.slane %v703_v43, 2  ;;  %vm175_vm7 = vcmp.eq.s32.totalorder %v87_v42, %v2414_v31  ;;  %v2146_v5 = vsel %vm172_vm4, 1.0, %v3389_v8  ;;  %v2147_v56 = vsel %vm173_vm5, 1.0, %v3389_v8 }
 0x176   :  { %v710_v25 = vrot.slane %v709_v35, 2  ;;  %v716_v37 = vrot.slane %v715_v50, 2  ;;  %v699_v54 = vadd.f32 %v698_v1, %v697_v51  ;;  %v2148_v0 = vsel %vm174_vm6, 1.0, %v3389_v8 }
 0x177   :  { %v3123_v9 = vadd.f32 %v1200_v15, %v1199_v32  ;;  %v3125_v17 = vadd.f32 %v704_v58, %v703_v43  ;;  %v2149_v45 = vsel %vm175_vm7, 1.0, %v3389_v8  ;;  %v504_v19 = vrot.slane %v2146_v5, 4 }
 0x178   :  { %v711_v6 = vadd.f32 %v710_v25, %v709_v35  ;;  %v700_v36 = vrot.slane %v699_v54, 1  ;;  %v510_v44 = vrot.slane %v2147_v56, 4  ;;  %v516_v34 = vrot.slane %v2148_v0, 4 }
 0x179   :  { %3423 = vst [vmem:[#allocation49_spill] sm:$0xff] %v3123_v9  ;;  %v3128_v51 = vadd.f32 %v716_v37, %v715_v50  ;;  %v522_v1 = vrot.slane %v2149_v45, 4  ;;  %vm908_vm8 = vcmp.eq.s32.totalorder %v847_v24, %v2405_v28  ;;  %v505_v60 = vadd.f32 %v2146_v5, %v504_v19  ;;  %v815_v5 = vpop.permute.xlu0 %814 }
 0x17a   :  { %v712_v42 = vrot.slane %v711_v6, 1  ;;  %v511_v23 = vadd.f32 %v2147_v56, %v510_v44  ;;  %v517_v27 = vadd.f32 %v2148_v0, %v516_v34  ;;  %vm909_vm9 = vcmp.eq.s32.totalorder %v847_v24, %v2408_v29 }
 0x17b   :  { %v3132_v43 = vadd.f32 %v700_v36, %v699_v54  ;;  %v523_v35 = vadd.f32 %v2149_v45, %v522_v1  ;;  %vm910_vm10 = vcmp.eq.s32.totalorder %v847_v24, %v2411_v30  ;;  %vm911_vm11 = vcmp.eq.s32.totalorder %v847_v24, %v2414_v31 }
 0x17c   :  { %v506_v32 = vrot.slane %v505_v60, 2  ;;  %v512_v15 = vrot.slane %v511_v23, 2  ;;  %v518_v58 = vrot.slane %v517_v27, 2  ;;  %v2242_v50 = vsel %vm908_vm8, 1.0, %v3389_v8 }
 0x17d   :  { %3424 = vst [vmem:[#allocation50_spill] sm:$0xff] %v3132_v43  ;;  %v524_v25 = vrot.slane %v523_v35, 2  ;;  %v2243_v37 = vsel %vm909_vm9, 1.0, %v3389_v8  ;;  %v2244_v44 = vsel %vm910_vm10, 1.0, %v3389_v8  ;;  %v2245_v34 = vsel %vm911_vm11, 1.0, %v3389_v8 }
 0x17e   :  { %v3140_v54 = vadd.f32 %v712_v42, %v711_v6  ;;  %v507_v56 = vadd.f32 %v506_v32, %v505_v60  ;;  %v519_v0 = vadd.f32 %v518_v58, %v517_v27  ;;  %v1400_v45 = vrot.slane %v2242_v50, 4 }
 0x17f   :  { %v513_v36 = vadd.f32 %v512_v15, %v511_v23  ;;  %v1406_v24 = vrot.slane %v2243_v37, 4  ;;  %v1412_v19 = vrot.slane %v2244_v44, 4  ;;  %v1418_v1 = vrot.slane %v2245_v34, 4 }
 0x180   :  { %v508_v9 = vrot.slane %v507_v56, 1  ;;  %v3142_v43 = vadd.f32 %v524_v25, %v523_v35  ;;  %v1401_v63 = vadd.f32 %v2242_v50, %v1400_v45  ;;  %vm876_vm12 = vcmp.eq.s32.totalorder %v815_v5, %v2405_v28 }
 0x181   :  { %v1407_v7 = vadd.f32 %v2243_v37, %v1406_v24  ;;  %v1413_v12 = vadd.f32 %v2244_v44, %v1412_v19  ;;  %v1419_v62 = vadd.f32 %v2245_v34, %v1418_v1  ;;  %vm877_vm13 = vcmp.eq.s32.totalorder %v815_v5, %v2408_v29 }
 0x182   :  { %v3146_v6 = vadd.f32 %v508_v9, %v507_v56  ;;  %v520_v60 = vrot.slane %v519_v0, 1  ;;  %v1402_v27 = vrot.slane %v1401_v63, 2  ;;  %vm878_vm14 = vcmp.eq.s32.totalorder %v815_v5, %v2411_v30 }
 0x183   :  { %v1408_v23 = vrot.slane %v1407_v7, 2  ;;  %v1414_v42 = vrot.slane %v1413_v12, 2  ;;  %v1420_v32 = vrot.slane %v1419_v62, 2  ;;  %vm879_vm15 = vcmp.eq.s32.totalorder %v815_v5, %v2414_v31 }
 0x184   :  { %v1403_v35 = vadd.f32 %v1402_v27, %v1401_v63  ;;  %v2210_v15 = vsel %vm876_vm12, 1.0, %v3389_v8  ;;  %v2211_v28 = vsel %vm877_vm13, 1.0, %v3389_v8  ;;  %v2212_v58 = vsel %vm878_vm14, 1.0, %v3389_v8 }
 0x185   :  { %v1409_v50 = vadd.f32 %v1408_v23, %v1407_v7  ;;  %v1415_v29 = vadd.f32 %v1414_v42, %v1413_v12  ;;  %v3153_v9 = vadd.f32 %v1420_v32, %v1419_v62  ;;  %v2213_v25 = vsel %vm879_vm15, 1.0, %v3389_v8 }
 0x186   :  { %v1404_v37 = vrot.slane %v1403_v35, 1  ;;  %v1208_v30 = vrot.slane %v2210_v15, 4  ;;  %v1214_v44 = vrot.slane %v2211_v28, 4  ;;  %v1220_v34 = vrot.slane %v2212_v58, 4 }
 0x187   :  { %v3156_v56 = vadd.f32 %v520_v60, %v519_v0  ;;  %v1410_v31 = vrot.slane %v1409_v50, 1  ;;  %v1416_v63 = vrot.slane %v1415_v29, 1  ;;  %v1226_v5 = vrot.slane %v2213_v25, 4 }
 0x188   :  { %v1209_v24 = vadd.f32 %v2210_v15, %v1208_v30  ;;  %v1215_v19 = vadd.f32 %v2211_v28, %v1214_v44  ;;  %v1221_v1 = vadd.f32 %v2212_v58, %v1220_v34  ;;  %v3159_v7 = vadd.f32 %v1404_v37, %v1403_v35 }
 0x189   :  { %v3161_v62 = vadd.f32 %v1416_v63, %v1415_v29  ;;  %v1227_v12 = vadd.f32 %v2213_v25, %v1226_v5  ;;  %v514_v8 = vrot.slane %v513_v36, 1  ;;  %v3425_v0 = vrot.slane %v3068_v48, 1 }
 0x18a   :  { %v1210_v27 = vrot.slane %v1209_v24, 2  ;;  %v1216_v23 = vrot.slane %v1215_v19, 2  ;;  %v1222_v42 = vrot.slane %v1221_v1, 2  ;;  %v3426_v45 = vrot.slane %v3051_v55, 1 }
 0x18b   :  { %v491_v60 = vadd.f32 %v3425_v0, %v3068_v48  ;;  %v1228_v32 = vrot.slane %v1227_v12, 2  ;;  %v706_v28 = vrot.slane %v3125_v17, 1  ;;  %v3427_v35 = vrot.slane %v3103_v18, 1 }
 0x18c   :  { %v683_v15 = vadd.f32 %v3426_v45, %v3051_v55  ;;  %v1211_v29 = vadd.f32 %v1210_v27, %v1209_v24  ;;  %v1217_v25 = vadd.f32 %v1216_v23, %v1215_v19  ;;  %v3173_v37 = vadd.f32 %v1222_v42, %v1221_v1 }
 0x18d   :  { %v1195_v58 = vadd.f32 %v3427_v35, %v3103_v18  ;;  %v3428_v30 = vrot.slane %v3085_v61, 1  ;;  %v1229_v48 = vadd.f32 %v1228_v32, %v1227_v12  ;;  %v515_v34 = vadd.f32 %v514_v8, %v513_v36 }
 0x18e   :  { %v1411_v63 = vadd.f32 %v1410_v31, %v1409_v50  ;;  %v1441_v55 = vadd.f32 %v2968_v21, %v2945_v13  ;;  %v1212_v5 = vrot.slane %v1211_v29, 1  ;;  %v1218_v45 = vrot.slane %v1217_v25, 1 }
 0x18f   :  { %v1387_v44 = vadd.f32 %v3428_v30, %v3085_v61  ;;  %v707_v0 = vadd.f32 %v706_v28, %v3125_v17  ;;  %v1445_v18 = vadd.f32 %v3033_v46, %v3002_v4  ;;  %v1224_v24 = vrot.slane %v3173_v37, 1 }
 0x190   :  { %v1449_v19 = vadd.f32 %v1195_v58, %v491_v60  ;;  %v1473_v1 = vadd.f32 %v2954_v47, %v2928_v10  ;;  %v1477_v61 = vadd.f32 %v3014_v53, %v2988_v39  ;;  %v3188_v36 = vadd.f32 %v1212_v5, %v1211_v29 }
 0x191   :  { %v1230_v50 = vrot.slane %v1229_v48, 1  ;;  %v1219_v13 = vadd.f32 %v1218_v45, %v1217_v25  ;;  %v1481_v21 = vadd.f32 %v1387_v44, %v683_v15  ;;  %v1485_v31 = vadd.f32 %v1411_v63, %v707_v0 }
 0x192   :  { %v1507_v12 = vpack.c.bf16 %v1441_v55, %v1441_v55  ;;  %v1511_v17 = vpack.c.bf16 %v1445_v18, %v1445_v18  ;;  %v1515_v8 = vpack.c.bf16 %v1449_v19, %v1449_v19  ;;  %v1539_v4 = vpack.c.bf16 %v1473_v1, %v1473_v1 }
 0x193   :  { %v1453_v27 = vadd.f32 %v1219_v13, %v515_v34  ;;  %v1543_v46 = vpack.c.bf16 %v1477_v61, %v1477_v61  ;;  %v1547_v23 = vpack.c.bf16 %v1481_v21, %v1481_v21  ;;  %v1551_v42 = vpack.c.bf16 %v1485_v31, %v1485_v31 }
 0x194   :  { %v3429_v10 = vpack.c.bf16 %v2860_v22, %v2860_v22  ;;  %v1699_v60 = vunpack.c.l.b16 %v1507_v12  ;;  %v1703_v39 = vunpack.c.l.b16 %v1511_v17  ;;  %v1707_v32 = vunpack.c.l.b16 %v1515_v8 }
 0x195   :  { %v1519_v53 = vpack.c.bf16 %v1453_v27, %v1453_v27  ;;  %v3430_v15 = vpack.c.bf16 %v2800_v11, %v2800_v11  ;;  %v1731_v35 = vunpack.c.l.b16 %v1539_v4  ;;  %v1735_v58 = vunpack.c.l.b16 %v1543_v46  ;;  %v3436_v4 = vld [vmem:[#allocation30_spill] sm:$0xff] }
 0x196   :  { %v1695_v47 = vunpack.c.l.b16 %v3429_v10  ;;  %v1739_v29 = vunpack.c.l.b16 %v1547_v23  ;;  %v1743_v25 = vunpack.c.l.b16 %v1551_v42  ;;  %vm1746_vm0 = vcmask 1041409   ;;  %v3438_v42 = vld [vmem:[#allocation36_spill] sm:$0xff] }
 0x197   :  { %v1727_v28 = vunpack.c.l.b16 %v3430_v15  ;;  %v1711_v30 = vunpack.c.l.b16 %v1519_v53  ;;  %vm1748_vm1 = vcmask 1042434   ;;  %vm1750_vm2 = vcmask 1043459  }
 0x198   :  { %vm1752_vm3 = vcmask 1044484   ;;  %vm1754_vm4 = vcmask 1045509   ;;  %vm1756_vm5 = vcmask 1046534   ;;  %vm1758_vm6 = vcmask 1047559  }
 0x199   :  { %v1760_v22 = vsel %vm1746_vm0, %v2530_v57, %v2568_v33  ;;  %v1788_v44 = vsel %vm1746_vm0, %v2596_v16, %v2663_v49  ;;  %v3431_v34 = vrot.slane %v3071_v59, 1  ;;  %v526_v55 = vrot.slane %v3142_v43, 1 }
 0x19a   :  { %v1761_v11 = vsel %vm1748_vm1, %v2732_v38, %v1760_v22  ;;  %v1789_v45 = vsel %vm1748_vm1, %v2698_v14, %v1788_v44  ;;  %v3432_v57 = vrot.slane %v3053_v2, 1  ;;  %v718_v38 = vrot.slane %v3128_v51, 1 }
 0x19b   :  { %v503_v63 = vadd.f32 %v3431_v34, %v3071_v59  ;;  %v1762_v5 = vsel %vm1750_vm2, %v1695_v47, %v1761_v11  ;;  %v1790_v16 = vsel %vm1750_vm2, %v1727_v28, %v1789_v45  ;;  %v527_v49 = vadd.f32 %v526_v55, %v3142_v43  ;;  %v3440_v28 = vld [vmem:[#allocation27_spill] sm:$0xff]  ;;  %v3442_v11 = vld [vmem:[#allocation24_spill] sm:$0xff] }
 0x19c   :  { %v695_v33 = vadd.f32 %v3432_v57, %v3053_v2  ;;  %v1763_v0 = vsel %vm1752_vm3, %v1699_v60, %v1762_v5  ;;  %v3433_v59 = vrot.slane %v3108_v26, 1  ;;  %v1791_v14 = vsel %vm1752_vm3, %v1731_v35, %v1790_v16  ;;  %v3444_v57 = vld [vmem:[#allocation11_spill] sm:$0xff]  ;;  %v3447_v16 = vld [vmem:[#allocation14_spill] sm:$0xff] }
 0x19d   :  { %v1764_v19 = vsel %vm1754_vm4, %v1703_v39, %v1763_v0  ;;  %v719_v1 = vadd.f32 %v718_v38, %v3128_v51  ;;  %v1231_v61 = vadd.f32 %v1230_v50, %v1229_v48  ;;  %v1792_v13 = vsel %vm1754_vm4, %v1735_v58, %v1791_v14  ;;  %v3446_v0 = vld [vmem:[#allocation17_spill] sm:$0xff] }
 0x19e   :  { %v1207_v18 = vadd.f32 %v3433_v59, %v3108_v26  ;;  %v1765_v2 = vsel %vm1756_vm5, %v1707_v32, %v1764_v19  ;;  %v3434_v21 = vrot.slane %v3092_v20, 1  ;;  %v3435_v43 = vrot.slane %v3153_v9, 1  ;;  %v3448_v59 = vld [vmem:[#allocation23_spill] sm:$0xff]  ;;  %v3449_v19 = vld [vmem:[#allocation20_spill] sm:$0xff] }
 0x19f   :  { %v1766_v26 = vsel %vm1758_vm6, %v1711_v30, %v1765_v2  ;;  %v1793_v17 = vsel %vm1756_vm5, %v1739_v29, %v1792_v13  ;;  %v1443_v51 = vadd.f32 %v2970_v40, %v2951_v3  ;;  %v1447_v48 = vadd.f32 %v3035_v41, %v3012_v52 }
 0x1a0   :  { %v1399_v31 = vadd.f32 %v3434_v21, %v3092_v20  ;;  %v1423_v12 = vadd.f32 %v3435_v43, %v3153_v9  ;;  %v1794_v50 = vsel %vm1758_vm6, %v1743_v25, %v1793_v17  ;;  %v1451_v8 = vadd.f32 %v1207_v18, %v503_v63  ;;  %v3437_v20 = vld [vmem:[#allocation32_spill] sm:$0xff]  ;;  %v3439_v9 = vld [vmem:[#allocation37_spill] sm:$0xff]  ;;  %v3452_v43 = vld [vmem:[#allocation42_spill] sm:$0xff] }
 0x1a1   :  { %v1455_v27 = vadd.f32 %v1231_v61, %v527_v49  ;;  %v1475_v46 = vadd.f32 %v3437_v20, %v3436_v4  ;;  %v1810_v23 = vpack.c.b16 %v1794_v50, %v1766_v26  ;;  %v1479_v10 = vadd.f32 %v3439_v9, %v3438_v42  ;;  %v3451_v61 = vld [vmem:[#allocation48_spill] sm:$0xff]  ;;  %v3454_v17 = vld [vmem:[#allocation50_spill] sm:$0xff] }
 0x1a2   :  { %v1483_v47 = vadd.f32 %v1399_v31, %v695_v33  ;;  %v1487_v60 = vadd.f32 %v1423_v12, %v719_v1  ;;  %v1509_v39 = vpack.c.bf16 %v1443_v51, %v1443_v51  ;;  %v1513_v53 = vpack.c.bf16 %v1447_v48, %v1447_v48  ;;  %v3445_v33 = vld [vmem:[#allocation8_spill] sm:$0xff]  ;;  %v3453_v12 = vld [vmem:[#allocation46_spill] sm:$0xff] }
 0x1a3   :  { %v1517_v32 = vpack.c.bf16 %v1451_v8, %v1451_v8  ;;  %v1521_v3 = vpack.c.bf16 %v1455_v27, %v1455_v27  ;;  %2041 = vmatprep.mubr.bf16.mxu0 %v1810_v23  ;;  %v1541_v40 = vpack.c.bf16 %v1475_v46, %v1475_v46  ;;  %v1545_v52 = vpack.c.bf16 %v1479_v10, %v1479_v10  ;;  %v3450_v1 = vld [vmem:[#allocation44_spill] sm:$0xff] }
 0x1a4   :  { %v1549_v41 = vpack.c.bf16 %v1483_v47, %v1483_v47  ;;  %v1553_v15 = vpack.c.bf16 %v1487_v60, %v1487_v60  ;;  %v3441_v35 = vpack.c.bf16 %v3440_v28, %v3440_v28  ;;  %v1701_v29 = vunpack.c.l.b16 %v1509_v39  ;;  %v3455_v42 = vld [vmem:[#allocation40_spill] sm:$0xff]  ;;  %v3461_v28 = vld [vmem:[#allocation21_spill] sm:$0xff] }
 0x1a5   :  { %v1705_v25 = vunpack.c.l.b16 %v1513_v53  ;;  %v1709_v30 = vunpack.c.l.b16 %v1517_v32  ;;  %v1713_v22 = vunpack.c.l.b16 %v1521_v3  ;;  %v3443_v44 = vpack.c.bf16 %v3442_v11, %v3442_v11  ;;  %v3457_v53 = vld [vmem:[#allocation38_spill] sm:$0xff] }
 0x1a6   :  { %v1697_v58 = vunpack.c.l.b16 %v3441_v35  ;;  %v1733_v63 = vunpack.c.l.b16 %v1541_v40  ;;  %v1737_v55 = vunpack.c.l.b16 %v1545_v52  ;;  %v1741_v5 = vunpack.c.l.b16 %v1549_v41  ;;  %v3459_v52 = vld [vmem:[#allocation9_spill] sm:$0xff]  ;;  %v3460_v41 = vld [vmem:[#allocation6_spill] sm:$0xff] }
 0x1a7   :  { %v1729_v34 = vunpack.c.l.b16 %v3443_v44  ;;  %v1745_v45 = vunpack.c.l.b16 %v1553_v15  ;;  %v1774_v38 = vsel %vm1746_vm0, %v3445_v33, %v3444_v57  ;;  %v1802_v49 = vsel %vm1746_vm0, %v3447_v16, %v3446_v0  ;;  %v3469_v57 = vld [vmem:[#allocation47_spill] sm:$0xff] }
 0x1a8   :  { %v1775_v18 = vsel %vm1748_vm1, %v3448_v59, %v1774_v38  ;;  %v1803_v14 = vsel %vm1748_vm1, %v3449_v19, %v1802_v49  ;;  %v1448_v2 = vadd.f32 %v3451_v61, %v3450_v1  ;;  %v1452_v13 = vadd.f32 %v3188_v36, %v3146_v6  ;;  %v3470_v16 = vld [vmem:[#allocation35_spill] sm:$0xff]  ;;  %v3471_v59 = vld [vmem:[#allocation25_spill] sm:$0xff] }
 0x1a9   :  { %v1776_v21 = vsel %vm1750_vm2, %v1697_v58, %v1775_v18  ;;  %v1804_v31 = vsel %vm1750_vm2, %v1729_v34, %v1803_v14  ;;  %v1480_v26 = vadd.f32 %v3453_v12, %v3452_v43  ;;  %v1484_v51 = vadd.f32 %v3159_v7, %v3454_v17  ;;  %v3462_v58 = vld [vmem:[#allocation15_spill] sm:$0xff]  ;;  %v3466_v34 = vld [vmem:[#allocation28_spill] sm:$0xff] }
 0x1aa   :  { %v1777_v48 = vsel %vm1752_vm3, %v1701_v29, %v1776_v21  ;;  %v1805_v50 = vsel %vm1752_vm3, %v1733_v63, %v1804_v31  ;;  %v1514_v8 = vpack.c.bf16 %v1448_v2, %v1448_v2  ;;  %v1518_v27 = vpack.c.bf16 %v1452_v13, %v1452_v13  ;;  %v3463_v29 = vld [vmem:[#allocation12_spill] sm:$0xff]  ;;  %v3472_v19 = vld [vmem:[#allocation31_spill] sm:$0xff]  ;;  %v3475_v21 = vld [vmem:[#allocation33_spill] sm:$0xff] }
 0x1ab   :  { %v1225_v6 = vadd.f32 %v1224_v24, %v3173_v37  ;;  %v1778_v36 = vsel %vm1754_vm4, %v1705_v25, %v1777_v48  ;;  %v1806_v4 = vsel %vm1754_vm4, %v1737_v55, %v1805_v50  ;;  %v1546_v20 = vpack.c.bf16 %v1480_v26, %v1480_v26  ;;  %v3467_v55 = vld [vmem:[#allocation18_spill] sm:$0xff]  ;;  %v3474_v61 = vld [vmem:[#allocation39_spill] sm:$0xff] }
 0x1ac   :  { %v1779_v46 = vsel %vm1756_vm5, %v1709_v30, %v1778_v36  ;;  %v1807_v23 = vsel %vm1756_vm5, %v1741_v5, %v1806_v4  ;;  %v1550_v7 = vpack.c.bf16 %v1484_v51, %v1484_v51  ;;  %v3456_v9 = vpack.c.bf16 %v3455_v42, %v3455_v42  ;;  %v3464_v30 = vld [vmem:[#allocation45_spill] sm:$0xff]  ;;  %v3476_v26 = vld [vmem:[#allocation34_spill] sm:$0xff] }
 0x1ad   :  { %v1780_v47 = vsel %vm1758_vm6, %v1713_v22, %v1779_v46  ;;  %v1808_v60 = vsel %vm1758_vm6, %v1745_v45, %v1807_v23  ;;  %v1706_v39 = vunpack.c.l.b16 %v1514_v8  ;;  %v1710_v37 = vunpack.c.l.b16 %v1518_v27  ;;  %v3465_v22 = vld [vmem:[#allocation49_spill] sm:$0xff]  ;;  %v3468_v45 = vld [vmem:[#allocation43_spill] sm:$0xff]  ;;  %v3480_v46 = vld [vmem:[#allocation10_spill] sm:$0xff] }
 0x1ae   :  { %v1702_v10 = vunpack.c.l.b16 %v3456_v9  ;;  %v1812_v24 = vpack.c.b16 %v1808_v60, %v1780_v47  ;;  %v3458_v32 = vpack.c.bf16 %v3457_v53, %v3457_v53  ;;  %v1738_v40 = vunpack.c.l.b16 %v1546_v20  ;;  %v3481_v23 = vld [vmem:[#allocation7_spill] sm:$0xff]  ;;  %v3483_v60 = vld [vmem:[#allocation16_spill] sm:$0xff] }
 0x1af   :  { %v1747_v15 = vsel %vm1746_vm0, %v3460_v41, %v3459_v52  ;;  %v1781_v25 = vsel %vm1746_vm0, %v3463_v29, %v3462_v58  ;;  %v1450_v11 = vadd.f32 %v3465_v22, %v3464_v30  ;;  %v1454_v44 = vadd.f32 %v1225_v6, %v3156_v56  ;;  %v3478_v6 = vld [vmem:[#allocation41_spill] sm:$0xff] }
 0x1b0   :  { %v1734_v3 = vunpack.c.l.b16 %v3458_v32  ;;  %v1749_v35 = vsel %vm1748_vm1, %v3461_v28, %v1747_v15  ;;  %2082 = vmatprep.mubr.bf16.mxu1 %v1812_v24  ;;  %v1782_v5 = vsel %vm1748_vm1, %v3467_v55, %v1781_v25  ;;  %v1482_v33 = vadd.f32 %v3469_v57, %v3468_v45  ;;  %v3485_v32 = vld [vmem:[#allocation29_spill] sm:$0xff]  ;;  %v3487_v28 = vld [vmem:[#allocation26_spill] sm:$0xff] }
 0x1b1   :  { %v1751_v63 = vsel %vm1750_vm2, %v3466_v34, %v1749_v35  ;;  %v1486_v38 = vadd.f32 %v3161_v62, %v3140_v54  ;;  %v1742_v0 = vunpack.c.l.b16 %v1550_v7  ;;  %v1783_v56 = vsel %vm1750_vm2, %v3471_v59, %v1782_v5 }
 0x1b2   :  { %v1753_v49 = vsel %vm1752_vm3, %v3470_v16, %v1751_v63  ;;  %v1516_v18 = vpack.c.bf16 %v1450_v11, %v1450_v11  ;;  %v3473_v14 = vpack.c.bf16 %v3472_v19, %v3472_v19  ;;  %v1544_v2 = vpack.c.bf16 %v3474_v61, %v3474_v61 }
 0x1b3   :  { %v1755_v13 = vsel %vm1754_vm4, %v1702_v10, %v1753_v49  ;;  %v1784_v54 = vsel %vm1752_vm3, %v3475_v21, %v1783_v56  ;;  %v1520_v43 = vpack.c.bf16 %v1454_v44, %v1454_v44  ;;  %v1548_v12 = vpack.c.bf16 %v1482_v33, %v1482_v33  ;;  %v3482_v10 = vld [vmem:[#allocation22_spill] sm:$0xff] }
 0x1b4   :  { %v1732_v1 = vunpack.c.l.b16 %v3473_v14  ;;  %v1757_v62 = vsel %vm1756_vm5, %v1706_v39, %v1755_v13  ;;  %v1785_v31 = vsel %vm1754_vm4, %v1734_v3, %v1784_v54  ;;  %v3477_v17 = vpack.c.bf16 %v3476_v26, %v3476_v26  ;;  %v3484_v39 = vld [vmem:[#allocation13_spill] sm:$0xff] }
 0x1b5   :  { %v1759_v48 = vsel %vm1758_vm6, %v1710_v37, %v1757_v62  ;;  %v1786_v50 = vsel %vm1756_vm5, %v1738_v40, %v1785_v31  ;;  %v1552_v8 = vpack.c.bf16 %v1486_v38, %v1486_v38  ;;  %v3479_v36 = vpack.c.bf16 %v3478_v6, %v3478_v6  ;;  %v3486_v40 = vld [vmem:[#allocation19_spill] sm:$0xff] }
 0x1b6   :  { %v1700_v51 = vunpack.c.l.b16 %v3477_v17  ;;  %v1787_v27 = vsel %vm1758_vm6, %v1742_v0, %v1786_v50  ;;  %v1708_v20 = vunpack.c.l.b16 %v1516_v18  ;;  %v1767_v7 = vsel %vm1746_vm0, %v3481_v23, %v3480_v46 }
 0x1b7   :  { %v1704_v4 = vunpack.c.l.b16 %v3479_v36  ;;  %v1809_v42 = vpack.c.b16 %v1787_v27, %v1759_v48  ;;  %v1736_v9 = vunpack.c.l.b16 %v1544_v2  ;;  %v1768_v47 = vsel %vm1748_vm1, %v3482_v10, %v1767_v7 }
 0x1b8   :  { %v1795_v37 = vsel %vm1746_vm0, %v3484_v39, %v3483_v60  ;;  %v1712_v24 = vunpack.c.l.b16 %v1520_v43  ;;  %v1740_v53 = vunpack.c.l.b16 %v1548_v12  ;;  %v1769_v3 = vsel %vm1750_vm2, %v3485_v32, %v1768_v47 }
 0x1b9   :  { %v1796_v52 = vsel %vm1748_vm1, %v3486_v40, %v1795_v37  ;;  %2042 = vmatmul.mubr.bf16.vlgmr.msra.gmra.mxu0 %v1809_v42  ;;  %v1744_v41 = vunpack.c.l.b16 %v1552_v8  ;;  %v1770_v15 = vsel %vm1752_vm3, %v1700_v51, %v1769_v3 }
 0x1ba   :  { %v1797_v35 = vsel %vm1750_vm2, %v3487_v28, %v1796_v52  ;;  %v1771_v58 = vsel %vm1754_vm4, %v1704_v4, %v1770_v15 }
 0x1bb   :  { %v1798_v29 = vsel %vm1752_vm3, %v1732_v1, %v1797_v35  ;;  %v1772_v25 = vsel %vm1756_vm5, %v1708_v20, %v1771_v58 }
 0x1bc   :  { %v1799_v30 = vsel %vm1754_vm4, %v1736_v9, %v1798_v29  ;;  %v1773_v22 = vsel %vm1758_vm6, %v1712_v24, %v1772_v25 }
 0x1bd   :  { %v1800_v11 = vsel %vm1756_vm5, %v1740_v53, %v1799_v30 }
 0x1be   :  { %v1801_v44 = vsel %vm1758_vm6, %v1744_v41, %v1800_v11 }
 0x1bf   :  { %v1811_v34 = vpack.c.b16 %v1801_v44, %v1773_v22 }
 0x1c1   :  { %2083 = vmatmul.mubr.bf16.vlgmr.msra.gmra.mxu1 %v1811_v34 }
 0x279   :  { %v2294_v63 = vpop.f32.mrf.mxu0 }
 0x27b   :  { %v2295_v55 = vpop.f32.mrf.mxu0 }
 0x27c   :  { %v2296_v57 = vadd.f32 %v2295_v55, %v2294_v63 }
 0x27d   :  { %v2297_v5 = vpop.f32.mrf.mxu0 }
 0x27f   :  { %v2298_v38 = vpop.f32.mrf.mxu0 }
 0x280   :  { %v2299_v59 = vadd.f32 %v2298_v38, %v2297_v5 }
 0x281   :  { %v2316_v45 = vpop.f32.mrf.mxu1 }
 0x283   :  { %v2317_v33 = vpop.f32.mrf.mxu1 }
 0x284   :  { %v2318_v0 = vadd.f32 %v2317_v33, %v2316_v45 }
 0x285   :  { %v2319_v16 = vpop.f32.mrf.mxu1 }
 0x286   :  { %v2085_v49 = vadd.f32 %v2318_v0, %v2296_v57 }
 0x287   :  { %v2320_v56 = vpop.f32.mrf.mxu1 }
 0x288   :  { %2100 = vst [vmem:[#allocation3] sm:$0xff] %v2085_v49  ;;  %v2321_v18 = vadd.f32 %v2320_v56, %v2319_v16 }
 0x28a   :  { %v2088_v19 = vadd.f32 %v2321_v18, %v2299_v59 }
 0x28c   :  { %2101 = vst [vmem:[#allocation3 + $0x8] sm:$0xff] %v2088_v19 }
 0x28d   :  { %2369 = shalt.err (!%p2366_p4)
}
 0x28e   :  { %s2382_s20 = smov 128   ;;  %s2383_s21 = smov 8  }
 0x28f   :  { %2113 = dma.vmem_to_hbm [thread:$0]  %s2108_s18, 256, %s3355_s2, [#allocation4], %s2382_s20, %s2382_s20, %s2383_s21  }
 0x290   :  { %2378 = dma.done.wait [#allocation4], 256  }
 0x291   :  { %2379 = vsyncadd [#allocation4], 4294967040 }
 0x292   :  { %2117 = vsyncpa [#allocation4], 1 }

</bundles_post_ra>
